<compile_context>
chip_gen: v7x
topology: tpu7x:2x2x1
jax: 0.10.0
libtpu: 0.0.40
codegen_flags: <defaults>
</compile_context>

<pallas_src>
import functools

import jax
import jax.numpy as jnp
from jax.experimental import pallas as pl
from jax.experimental.pallas import tpu as pltpu

SCALE = 0.7071067811865476  # sqrt(1/2), matches torch.sqrt(FloatTensor([1/2]))
HALO = 16                   # bf16 sublane-aligned conv halo (supports kernel_size <= 33)


# --------------------------------------------------------------------------- #
# Fused kernel: map Linear + all encoder layers, one grid step = Bt graphs
# --------------------------------------------------------------------------- #
def fused_encoder_kernel(*refs, n_layers, kernels, L_valid, Lp, Bt, Cpad):
    x_ref, adj_ref, wmap_ref, bmap_ref = refs[:4]
    layer_refs = refs[4:4 + 6 * n_layers]
    o_ref = refs[4 + 6 * n_layers]
    pad_buf = refs[5 + 6 * n_layers]          # VMEM scratch (Bt, Lp + 2*HALO, Cpad) bf16

    N = Bt * Lp
    E = x_ref.shape[-1]

    # Zero only the halo rows; the center [HALO:HALO+Lp] is overwritten every layer.
    pad_buf[:, :HALO, :] = jnp.zeros((Bt, HALO, Cpad), jnp.bfloat16)
    pad_buf[:, HALO + Lp:, :] = jnp.zeros((Bt, HALO, Cpad), jnp.bfloat16)

    # --- initial map Linear(E -> H), H zero-padded to Cpad -------------------
    x_in = x_ref[...].reshape(N, E).astype(jnp.bfloat16)
    x = jnp.dot(x_in, wmap_ref[...], preferred_element_type=jnp.float32) + bmap_ref[...]

    adj = adj_ref[...]                        # (Bt, Lp, Lp) bf16, resident for all layers

    # Zero-mask for padded sequence rows (they pick up b_map and would otherwise
    # leak into the conv window; adjacency cols for padded nodes are already 0).
    if Lp != L_valid:
        row_mask = (jax.lax.broadcasted_iota(jnp.int32, (Bt, Lp, 1), 1)
                    < L_valid).astype(jnp.float32)
    else:
        row_mask = None

    for li in range(n_layers):
        wc, bc, w1, b1, w2, b2 = layer_refs[6 * li:6 * li + 6]
        K = kernels[li]
        pad = K // 2

        # --- Conv1d(C, 2C, K, padding=K//2) as ONE im2col matmul (bf16 taps) --
        x3 = x.reshape(Bt, Lp, Cpad)
        if row_mask is not None:
            x3 = x3 * row_mask
        pad_buf[:, HALO:HALO + Lp, :] = x3.astype(jnp.bfloat16)   # aligned bf16 store
        taps = [pad_buf[:, HALO - pad + k: HALO - pad + k + Lp, :] for k in range(K)]
        im2col = jnp.concatenate(taps, axis=-1).reshape(N, K * Cpad)
        conv = jnp.dot(im2col, wc[...], preferred_element_type=jnp.float32) + bc[...]
        # TODO(synk): on v5e, split into K accumulated per-tap matmuls instead of the
        # (N, K*Cpad) im2col if vst/spill pressure shows up (128-deep MXU loses nothing).

        # --- GLU (channel halves live at [0:Cpad] and [Cpad:2*Cpad]) ----------
        cnn = conv[:, :Cpad] * jax.nn.sigmoid(conv[:, Cpad:])
        cnn = (cnn + x) * SCALE                                   # residual + scale, f32

        # --- GIN ('sum', eps=0): agg = h + A @ h, then MLP, ReLU --------------
        cnn3 = cnn.reshape(Bt, Lp, Cpad)
        msg = jnp.einsum("bij,bjc->bic", adj, cnn3.astype(jnp.bfloat16),
                         preferred_element_type=jnp.float32)
        agg = (cnn3 + msg).reshape(N, Cpad)
        # TODO(synk): for very long proteins (L >~ 1500) on v7x, stream the adjacency
        # in (Bt, Lp, Lk) key-axis blocks instead of holding the full slab in VMEM.

        h = jnp.dot(agg.astype(jnp.bfloat16), w1[...],
                    preferred_element_type=jnp.float32) + b1[...]
        h = jnp.maximum(h, 0.0)
        h = jnp.dot(h.astype(jnp.bfloat16), w2[...],
                    preferred_element_type=jnp.float32) + b2[...]
        h = jnp.maximum(h, 0.0)

        x = (h + cnn) * SCALE                                     # (N, Cpad) f32

    o_ref[...] = x.reshape(Bt, Lp, Cpad)


# --------------------------------------------------------------------------- #
# VMEM budget from actual block sizes (explicit limit instead of the default)
# --------------------------------------------------------------------------- #
def _vmem_limit_bytes(bt, Lp, E, Cpad, kernels):
    n = bt * Lp
    kmax = max(kernels)
    est = 0
    est += 2 * bt * Lp * E * 4                      # protein block, double-buffered
    est += 2 * bt * Lp * Lp * 2                     # adjacency block (bf16), double-buffered
    est += 2 * bt * Lp * Cpad * 4                   # output block, double-buffered
    est += bt * (Lp + 2 * HALO) * Cpad * 2          # pad_buf scratch (bf16)
    est += E * Cpad * 2 + Cpad * 4                  # map W/b, single-buffered
    for K in kernels:                               # per-layer weights, single-buffered
        est += K * Cpad * 2 * Cpad * 2 + 2 * Cpad * 4
        est += 2 * (Cpad * Cpad * 2 + Cpad * 4)
    # in-kernel intermediates: im2col (bf16), conv (f32), ~8 live (N, Cpad) f32 temps
    est += n * kmax * Cpad * 2 + n * 2 * Cpad * 4 + 8 * n * Cpad * 4
    return min(max(2 * est + (4 << 20), 8 << 20), 64 << 20)   # headroom, <= v7x physical


# --------------------------------------------------------------------------- #
# Wrapper: BlockSpecs, grid, and the final (B, H, L) PyTorch layout
# --------------------------------------------------------------------------- #
def protein_encoder_forward(protein, adj, packed, hidden_dim):
    B, L, E = protein.shape
    Cpad = packed["cpad"]
    n_layers = len(packed["layers"])
    kernels = tuple(l["kernel"] for l in packed["layers"])
    assert all(k % 2 == 1 and k // 2 <= HALO for k in kernels)

    # Pad L to a multiple of 8 so the (N, Cpad) <-> (Bt, L, Cpad) reshapes stay
    # (8, 128)-tile aligned; padded rows are zero-masked in-kernel.
    Lp = int(pl.cdiv(L, 8)) * 8
    if Lp != L:
        protein = jnp.pad(protein, ((0, 0), (0, Lp - L), (0, 0)))
        adj = jnp.pad(adj, ((0, 0), (0, Lp - L), (0, Lp - L)))
    if adj.dtype != jnp.bfloat16:
        # Prefer storing the adjacency in bf16 up front so this HBM pass is not per-call.
        adj = adj.astype(jnp.bfloat16)

    # Graphs per grid step: target ~512 rows of MXU M, but keep grid >= 2 so both
    # TensorCores stay busy on v7x (per-step overhead ~0.35us elsewhere -> negligible).
    bt = max(1, min(B, pl.cdiv(512, Lp)))
    if B >= 2:
        bt = min(bt, max(1, B // 2))
    while B % bt:
        bt -= 1

    def const_spec(shape):
        # Weights/biases never change across the grid: single-buffer them.
        return pl.BlockSpec(shape, lambda b: (0,) * len(shape),
                            pipeline_mode=pl.Buffered(1))

    in_specs = [
        pl.BlockSpec((bt, Lp, E), lambda b: (b, 0, 0)),            # protein block
        pl.BlockSpec((bt, Lp, Lp), lambda b: (b, 0, 0)),           # adjacency block (bf16)
        const_spec((E, Cpad)),                                     # map W (bf16)
        const_spec((1, Cpad)),                                     # map b (f32)
    ]
    inputs = [protein, adj, packed["w_map"], packed["b_map"]]
    for layer in packed["layers"]:
        K = layer["kernel"]
        inputs += list(layer["params"])
        in_specs += [
            const_spec((K * Cpad, 2 * Cpad)),                      # im2col conv W (bf16)
            const_spec((1, 2 * Cpad)),                             # conv b (f32)
            const_spec((Cpad, Cpad)),                              # gin lin1 W (bf16)
            const_spec((1, Cpad)),                                 # gin lin1 b (f32)
            const_spec((Cpad, Cpad)),                              # gin lin2 W (bf16)
            const_spec((1, Cpad)),                                 # gin lin2 b (f32)
        ]

    kern = functools.partial(fused_encoder_kernel, n_layers=n_layers, kernels=kernels,
                             L_valid=L, Lp=Lp, Bt=bt, Cpad=Cpad)
    y = pl.pallas_call(
        kern,
        out_shape=jax.ShapeDtypeStruct((B, Lp, Cpad), jnp.float32),
        grid_spec=pltpu.PrefetchScalarGridSpec(
            num_scalar_prefetch=0,
            grid=(B // bt,),
            in_specs=in_specs,
            out_specs=pl.BlockSpec((bt, Lp, Cpad), lambda b: (b, 0, 0)),
            scratch_shapes=[pltpu.VMEM((bt, Lp + 2 * HALO, Cpad), jnp.bfloat16)],
        ),
        compiler_params=pltpu.CompilerParams(
            dimension_semantics=("parallel",),
            vmem_limit_bytes=_vmem_limit_bytes(bt, Lp, E, Cpad, kernels),
        ),
    )(*inputs)

    # Strip L/channel padding, return PyTorch layout (B, H, L).
    # TODO(synk): when L % 128 == 0, fold this slice+transpose into the kernel (write
    # (bt, H, L) lane-dense) and emit bf16 if downstream allows, to cut writeback.
    return jnp.transpose(y[:, :L, :hidden_dim], (0, 2, 1))


# --------------------------------------------------------------------------- #
# Parameter packing: zero-pad channels to Cpad, build im2col conv weights, bf16
# --------------------------------------------------------------------------- #
def pack_params(params, cpad):
    E, H = params["w_map"].shape
    assert H <= cpad
    wmap = jnp.zeros((E, cpad), jnp.float32).at[:, :H].set(params["w_map"])
    bmap = jnp.zeros((1, cpad), jnp.float32).at[:, :H].set(params["b_map"])
    packed = {"cpad": cpad,
              "w_map": wmap.astype(jnp.bfloat16),
              "b_map": bmap,
              "layers": []}
    for layer in params["layers"]:
        wc, bc, w1, b1, w2, b2 = layer["params"]
        K, cin, two_c = wc.shape
        C = two_c // 2
        wc_p = jnp.zeros((K * cpad, 2 * cpad), jnp.float32)
        for k in range(K):
            wc_p = wc_p.at[k * cpad:k * cpad + cin, :C].set(wc[k, :, :C])
            wc_p = wc_p.at[k * cpad:k * cpad + cin, cpad:cpad + C].set(wc[k, :, C:])
        bc_p = (jnp.zeros((1, 2 * cpad), jnp.float32)
                .at[:, :C].set(bc[:, :C])
                .at[:, cpad:cpad + C].set(bc[:, C:]))
        w1_p = jnp.zeros((cpad, cpad), jnp.float32).at[:C, :C].set(w1)
        b1_p = jnp.zeros((1, cpad), jnp.float32).at[:, :C].set(b1)
        w2_p = jnp.zeros((cpad, cpad), jnp.float32).at[:C, :C].set(w2)
        b2_p = jnp.zeros((1, cpad), jnp.float32).at[:, :C].set(b2)
        packed["layers"].append({
            "kernel": K,
            "params": (wc_p.astype(jnp.bfloat16), bc_p,
                       w1_p.astype(jnp.bfloat16), b1_p,
                       w2_p.astype(jnp.bfloat16), b2_p),
        })
    return packed


# --------------------------------------------------------------------------- #
# Pure-JAX f32 reference (for verification)
# --------------------------------------------------------------------------- #
def ref_forward(protein, adj, params):
    x = protein @ params["w_map"] + params["b_map"]
    for layer in params["layers"]:
        wc, bc, w1, b1, w2, b2 = layer["params"]
        K = layer["kernel"]
        pad = K // 2
        B, L, C = x.shape
        xpad = jnp.pad(x, ((0, 0), (pad, pad), (0, 0)))
        acc = jnp.zeros((B, L, 2 * C), jnp.float32) + bc
        for k in range(K):
            acc = acc + jnp.einsum("blc,cd->bld", xpad[:, k:k + L], wc[k])
        cnn = acc[..., :C] * jax.nn.sigmoid(acc[..., C:])
        cnn = (cnn + x) * SCALE
        agg = cnn + jnp.einsum("bij,bjc->bic", adj, cnn)
        h = jnp.maximum(agg @ w1 + b1, 0.0)
        h = jnp.maximum(h @ w2 + b2, 0.0)
        x = (h + cnn) * SCALE
    return jnp.transpose(x, (0, 2, 1))


# --------------------------------------------------------------------------- #
# Deterministic parameter / input construction
# --------------------------------------------------------------------------- #
def make_params(key, embedding_dim, hidden_dim, filters, kernels):
    keys = iter(jax.random.split(key, 4 + 8 * len(filters)))
    params = {
        "w_map": 0.1 * jax.random.normal(next(keys), (embedding_dim, hidden_dim), jnp.float32),
        "b_map": 0.1 * jax.random.normal(next(keys), (1, hidden_dim), jnp.float32),
        "layers": [],
    }
    chans = [hidden_dim] + filters
    for i in range(len(filters)):
        cin, cout, K = chans[i], chans[i + 1], kernels[i]
        assert cin == cout, "residual connections require equal in/out channels"
        layer = {
            "kernel": K,
            "params": (
                0.1 * jax.random.normal(next(keys), (K, cin, 2 * cout), jnp.float32),  # conv W
                0.1 * jax.random.normal(next(keys), (1, 2 * cout), jnp.float32),       # conv b
                0.1 * jax.random.normal(next(keys), (cout, cout), jnp.float32),        # gin lin1 W
                0.1 * jax.random.normal(next(keys), (1, cout), jnp.float32),           # gin lin1 b
                0.1 * jax.random.normal(next(keys), (cout, cout), jnp.float32),        # gin lin2 W
                0.1 * jax.random.normal(next(keys), (1, cout), jnp.float32),           # gin lin2 b
            ),
        }
        params["layers"].append(layer)
    return params


def make_chain_adjacency(batch, n_nodes):
    # bidirectional chain graph for each protein (node i <-> i+1)
    idx = jnp.arange(n_nodes)
    a = (jnp.abs(idx[:, None] - idx[None, :]) == 1).astype(jnp.float32)
    return jnp.broadcast_to(a, (batch, n_nodes, n_nodes))


# TODO(synk): dropout defined in ProteinEncoderLayer.__init__ is never applied in its
# forward(), so it is intentionally omitted here.

if __name__ == "__main__":
    B, L, E, H = 2, 16, 8, 32
    filters = [H, H]          # residual requires filters == hidden_dim
    kernels = [3, 5]

    key = jax.random.PRNGKey(0)
    k_in, k_par = jax.random.split(key)
    protein = jax.random.normal(k_in, (B, L, E), jnp.float32)   # (batch, seq, emb)
    adj = make_chain_adjacency(B, L)                            # dense graph (B, L, L)
    adj_bf16 = adj.astype(jnp.bfloat16)                         # store adjacency in bf16 once
    params = make_params(k_par, E, H, filters, kernels)
    packed = pack_params(params, cpad=128)   # lane-dense channels; 128 also fits v7x's 64 MiB

    out = protein_encoder_forward(protein, adj_bf16, packed, hidden_dim=H)
    out = jax.block_until_ready(out)

    ref = ref_forward(protein, adj, params)
    assert out.shape == (B, H, L), out.shape
    # bf16 MXU operands (f32 accumulation) vs the pure-f32 reference -> loosened tolerance.
    assert jnp.allclose(out, ref, rtol=3e-2, atol=3e-2), float(jnp.max(jnp.abs(out - ref)))

    print("KERNEL_OK")
</pallas_src>

<mosaic_0001>
module attributes {stable_mosaic.version = 11 : i64} {
  func.func @fused_encoder_kernel(%arg0: i32, %arg1: memref<1x16x8xf32, #tpu.memory_space<vmem>>, %arg2: memref<1x16x16xbf16, #tpu.memory_space<vmem>>, %arg3: memref<8x128xbf16, #tpu.memory_space<vmem>>, %arg4: memref<1x128xf32, #tpu.memory_space<vmem>>, %arg5: memref<384x256xbf16, #tpu.memory_space<vmem>>, %arg6: memref<1x256xf32, #tpu.memory_space<vmem>>, %arg7: memref<128x128xbf16, #tpu.memory_space<vmem>>, %arg8: memref<1x128xf32, #tpu.memory_space<vmem>>, %arg9: memref<128x128xbf16, #tpu.memory_space<vmem>>, %arg10: memref<1x128xf32, #tpu.memory_space<vmem>>, %arg11: memref<640x256xbf16, #tpu.memory_space<vmem>>, %arg12: memref<1x256xf32, #tpu.memory_space<vmem>>, %arg13: memref<128x128xbf16, #tpu.memory_space<vmem>>, %arg14: memref<1x128xf32, #tpu.memory_space<vmem>>, %arg15: memref<128x128xbf16, #tpu.memory_space<vmem>>, %arg16: memref<1x128xf32, #tpu.memory_space<vmem>>, %arg17: memref<1x16x128xf32, #tpu.memory_space<vmem>>, %arg18: memref<1x48x128xbf16, #tpu.memory_space<vmem>>) attributes {dimension_semantics = [#tpu.dimension_semantics<parallel>], iteration_bounds = array<i64: 2>, scalar_prefetch = 0 : i64, scratch_operands = 1 : i64, tpu.core_type = #tpu.core_type<tc>, window_params = [{transform_indices = @transform_0, window_bounds = array<i64: 1, 16, 8>}, {transform_indices = @transform_1, window_bounds = array<i64: 1, 16, 16>}, {pipeline_mode = #tpu.pipeline_mode<synchronous>, transform_indices = @transform_2, window_bounds = array<i64: 8, 128>}, {pipeline_mode = #tpu.pipeline_mode<synchronous>, transform_indices = @transform_3, window_bounds = array<i64: 1, 128>}, {pipeline_mode = #tpu.pipeline_mode<synchronous>, transform_indices = @transform_4, window_bounds = array<i64: 384, 256>}, {pipeline_mode = #tpu.pipeline_mode<synchronous>, transform_indices = @transform_5, window_bounds = array<i64: 1, 256>}, {pipeline_mode = #tpu.pipeline_mode<synchronous>, transform_indices = @transform_6, window_bounds = array<i64: 128, 128>}, {pipeline_mode = #tpu.pipeline_mode<synchronous>, transform_indices = @transform_7, window_bounds = array<i64: 1, 128>}, {pipeline_mode = #tpu.pipeline_mode<synchronous>, transform_indices = @transform_8, window_bounds = array<i64: 128, 128>}, {pipeline_mode = #tpu.pipeline_mode<synchronous>, transform_indices = @transform_9, window_bounds = array<i64: 1, 128>}, {pipeline_mode = #tpu.pipeline_mode<synchronous>, transform_indices = @transform_10, window_bounds = array<i64: 640, 256>}, {pipeline_mode = #tpu.pipeline_mode<synchronous>, transform_indices = @transform_11, window_bounds = array<i64: 1, 256>}, {pipeline_mode = #tpu.pipeline_mode<synchronous>, transform_indices = @transform_12, window_bounds = array<i64: 128, 128>}, {pipeline_mode = #tpu.pipeline_mode<synchronous>, transform_indices = @transform_13, window_bounds = array<i64: 1, 128>}, {pipeline_mode = #tpu.pipeline_mode<synchronous>, transform_indices = @transform_14, window_bounds = array<i64: 128, 128>}, {pipeline_mode = #tpu.pipeline_mode<synchronous>, transform_indices = @transform_15, window_bounds = array<i64: 1, 128>}, {transform_indices = @transform_16, window_bounds = array<i64: 1, 16, 128>}]} {
    %cst = arith.constant 0.000000e+00 : bf16
    %0 = vector.broadcast %cst : bf16 to vector<1x16x128xbf16>
    %c0 = arith.constant 0 : index
    %c0_0 = arith.constant 0 : index
    %c0_1 = arith.constant 0 : index
    %1 = vector.load %arg18[%c0, %c0_0, %c0_1] : memref<1x48x128xbf16, #tpu.memory_space<vmem>>, vector<1x16x128xbf16>
    tpu.vector_store %arg18[%c0, %c0_0, %c0_1], %0 {strides = array<i32>} : memref<1x48x128xbf16, #tpu.memory_space<vmem>>, vector<1x16x128xbf16>,
    %cst_2 = arith.constant 0.000000e+00 : bf16
    %2 = vector.broadcast %cst_2 : bf16 to vector<1x16x128xbf16>
    %c0_3 = arith.constant 0 : index
    %c32 = arith.constant 32 : index
    %c0_4 = arith.constant 0 : index
    %3 = vector.load %arg18[%c0_3, %c32, %c0_4] : memref<1x48x128xbf16, #tpu.memory_space<vmem>>, vector<1x16x128xbf16>
    tpu.vector_store %arg18[%c0_3, %c32, %c0_4], %2 {strides = array<i32>} : memref<1x48x128xbf16, #tpu.memory_space<vmem>>, vector<1x16x128xbf16>,
    %c0_5 = arith.constant 0 : index
    %c0_6 = arith.constant 0 : index
    %c0_7 = arith.constant 0 : index
    %4 = vector.load %arg1[%c0_5, %c0_6, %c0_7] : memref<1x16x8xf32, #tpu.memory_space<vmem>>, vector<1x16x8xf32>
    %5 = vector.shape_cast %4 : vector<1x16x8xf32> to vector<16x8xf32>
    %6 = arith.truncf %5 : vector<16x8xf32> to vector<16x8xbf16>
    %c0_8 = arith.constant 0 : index
    %c0_9 = arith.constant 0 : index
    %7 = vector.load %arg3[%c0_8, %c0_9] : memref<8x128xbf16, #tpu.memory_space<vmem>>, vector<8x128xbf16>
    %cst_10 = arith.constant dense<0.000000e+00> : vector<16x128xf32>
    %8 = tpu.matmul %6, %7, %cst_10 {dimension_numbers = #tpu.dot_dimension_numbers<[1], [0], [0], [1], [0, 0, 1, 1], [], []>} : vector<16x8xbf16>, vector<8x128xbf16>, vector<16x128xf32> -> vector<16x128xf32>
    %c0_11 = arith.constant 0 : index
    %c0_12 = arith.constant 0 : index
    %9 = vector.load %arg4[%c0_11, %c0_12] : memref<1x128xf32, #tpu.memory_space<vmem>>, vector<1x128xf32>
    %10 = vector.broadcast %9 : vector<1x128xf32> to vector<16x128xf32>
    %11 = arith.addf %8, %10 : vector<16x128xf32>
    %c0_13 = arith.constant 0 : index
    %c0_14 = arith.constant 0 : index
    %c0_15 = arith.constant 0 : index
    %12 = vector.load %arg2[%c0_13, %c0_14, %c0_15] : memref<1x16x16xbf16, #tpu.memory_space<vmem>>, vector<1x16x16xbf16>
    %13 = vector.shape_cast %11 : vector<16x128xf32> to vector<1x16x128xf32>
    %14 = arith.truncf %13 : vector<1x16x128xf32> to vector<1x16x128xbf16>
    %c0_16 = arith.constant 0 : index
    %c16 = arith.constant 16 : index
    %c0_17 = arith.constant 0 : index
    %15 = vector.load %arg18[%c0_16, %c16, %c0_17] : memref<1x48x128xbf16, #tpu.memory_space<vmem>>, vector<1x16x128xbf16>
    tpu.vector_store %arg18[%c0_16, %c16, %c0_17], %14 {strides = array<i32>} : memref<1x48x128xbf16, #tpu.memory_space<vmem>>, vector<1x16x128xbf16>,
    %c0_18 = arith.constant 0 : index
    %c15 = arith.constant 15 : index
    %c0_19 = arith.constant 0 : index
    %16 = vector.load %arg18[%c0_18, %c15, %c0_19] : memref<1x48x128xbf16, #tpu.memory_space<vmem>>, vector<1x16x128xbf16>
    %c0_20 = arith.constant 0 : index
    %c16_21 = arith.constant 16 : index
    %c0_22 = arith.constant 0 : index
    %17 = vector.load %arg18[%c0_20, %c16_21, %c0_22] : memref<1x48x128xbf16, #tpu.memory_space<vmem>>, vector<1x16x128xbf16>
    %c0_23 = arith.constant 0 : index
    %c17 = arith.constant 17 : index
    %c0_24 = arith.constant 0 : index
    %18 = vector.load %arg18[%c0_23, %c17, %c0_24] : memref<1x48x128xbf16, #tpu.memory_space<vmem>>, vector<1x16x128xbf16>
    %19 = tpu.concatenate %16, %17, %18 in 2 : vector<1x16x128xbf16>, vector<1x16x128xbf16>, vector<1x16x128xbf16> -> vector<1x16x384xbf16>
    %20 = vector.shape_cast %19 : vector<1x16x384xbf16> to vector<16x384xbf16>
    %c0_25 = arith.constant 0 : index
    %c0_26 = arith.constant 0 : index
    %21 = vector.load %arg5[%c0_25, %c0_26] : memref<384x256xbf16, #tpu.memory_space<vmem>>, vector<384x256xbf16>
    %cst_27 = arith.constant dense<0.000000e+00> : vector<16x256xf32>
    %22 = tpu.matmul %20, %21, %cst_27 {dimension_numbers = #tpu.dot_dimension_numbers<[1], [0], [0], [1], [0, 0, 1, 1], [], []>} : vector<16x384xbf16>, vector<384x256xbf16>, vector<16x256xf32> -> vector<16x256xf32>
    %c0_28 = arith.constant 0 : index
    %c0_29 = arith.constant 0 : index
    %23 = vector.load %arg6[%c0_28, %c0_29] : memref<1x256xf32, #tpu.memory_space<vmem>>, vector<1x256xf32>
    %24 = vector.broadcast %23 : vector<1x256xf32> to vector<16x256xf32>
    %25 = arith.addf %22, %24 : vector<16x256xf32>
    %26 = vector.extract_strided_slice %25 {offsets = [0, 0], sizes = [16, 128], strides = [1, 1]} : vector<16x256xf32> to vector<16x128xf32>
    %27 = vector.extract_strided_slice %25 {offsets = [0, 128], sizes = [16, 128], strides = [1, 1]} : vector<16x256xf32> to vector<16x128xf32>
    %28 = arith.negf %27 : vector<16x128xf32>
    %29 = math.exp %28 : vector<16x128xf32>
    %cst_30 = arith.constant 1.000000e+00 : f32
    %30 = vector.broadcast %cst_30 : f32 to vector<16x128xf32>
    %31 = arith.addf %30, %29 : vector<16x128xf32>
    %32 = arith.divf %30, %31 : vector<16x128xf32>
    %33 = arith.mulf %26, %32 : vector<16x128xf32>
    %34 = arith.addf %33, %11 : vector<16x128xf32>
    %cst_31 = arith.constant 0.707106769 : f32
    %35 = vector.broadcast %cst_31 : f32 to vector<16x128xf32>
    %36 = arith.mulf %34, %35 : vector<16x128xf32>
    %37 = vector.shape_cast %36 : vector<16x128xf32> to vector<1x16x128xf32>
    %38 = arith.truncf %37 : vector<1x16x128xf32> to vector<1x16x128xbf16>
    "tpu.trace_start"() <{level = 10 : i32, message = "bij,bjc->bic"}> : () -> ()
    %cst_32 = arith.constant dense<0.000000e+00> : vector<1x16x128xf32>
    %39 = tpu.matmul %12, %38, %cst_32 {dimension_numbers = #tpu.dot_dimension_numbers<[2], [1], [1], [2], [0, 0, 0, 1, 1, 2], [0], [0]>} : vector<1x16x16xbf16>, vector<1x16x128xbf16>, vector<1x16x128xf32> -> vector<1x16x128xf32>
    "tpu.trace_stop"() : () -> ()
    %40 = arith.addf %37, %39 : vector<1x16x128xf32>
    %41 = vector.shape_cast %40 : vector<1x16x128xf32> to vector<16x128xf32>
    %42 = arith.truncf %41 : vector<16x128xf32> to vector<16x128xbf16>
    %c0_33 = arith.constant 0 : index
    %c0_34 = arith.constant 0 : index
    %43 = vector.load %arg7[%c0_33, %c0_34] : memref<128x128xbf16, #tpu.memory_space<vmem>>, vector<128x128xbf16>
    %cst_35 = arith.constant dense<0.000000e+00> : vector<16x128xf32>
    %44 = tpu.matmul %42, %43, %cst_35 {dimension_numbers = #tpu.dot_dimension_numbers<[1], [0], [0], [1], [0, 0, 1, 1], [], []>} : vector<16x128xbf16>, vector<128x128xbf16>, vector<16x128xf32> -> vector<16x128xf32>
    %c0_36 = arith.constant 0 : index
    %c0_37 = arith.constant 0 : index
    %45 = vector.load %arg8[%c0_36, %c0_37] : memref<1x128xf32, #tpu.memory_space<vmem>>, vector<1x128xf32>
    %46 = vector.broadcast %45 : vector<1x128xf32> to vector<16x128xf32>
    %47 = arith.addf %44, %46 : vector<16x128xf32>
    %cst_38 = arith.constant 0.000000e+00 : f32
    %48 = vector.broadcast %cst_38 : f32 to vector<16x128xf32>
    %49 = arith.maximumf %47, %48 : vector<16x128xf32>
    %50 = arith.truncf %49 : vector<16x128xf32> to vector<16x128xbf16>
    %c0_39 = arith.constant 0 : index
    %c0_40 = arith.constant 0 : index
    %51 = vector.load %arg9[%c0_39, %c0_40] : memref<128x128xbf16, #tpu.memory_space<vmem>>, vector<128x128xbf16>
    %cst_41 = arith.constant dense<0.000000e+00> : vector<16x128xf32>
    %52 = tpu.matmul %50, %51, %cst_41 {dimension_numbers = #tpu.dot_dimension_numbers<[1], [0], [0], [1], [0, 0, 1, 1], [], []>} : vector<16x128xbf16>, vector<128x128xbf16>, vector<16x128xf32> -> vector<16x128xf32>
    %c0_42 = arith.constant 0 : index
    %c0_43 = arith.constant 0 : index
    %53 = vector.load %arg10[%c0_42, %c0_43] : memref<1x128xf32, #tpu.memory_space<vmem>>, vector<1x128xf32>
    %54 = vector.broadcast %53 : vector<1x128xf32> to vector<16x128xf32>
    %55 = arith.addf %52, %54 : vector<16x128xf32>
    %cst_44 = arith.constant 0.000000e+00 : f32
    %56 = vector.broadcast %cst_44 : f32 to vector<16x128xf32>
    %57 = arith.maximumf %55, %56 : vector<16x128xf32>
    %58 = arith.addf %57, %36 : vector<16x128xf32>
    %cst_45 = arith.constant 0.707106769 : f32
    %59 = vector.broadcast %cst_45 : f32 to vector<16x128xf32>
    %60 = arith.mulf %58, %59 : vector<16x128xf32>
    %61 = vector.shape_cast %60 : vector<16x128xf32> to vector<1x16x128xf32>
    %62 = arith.truncf %61 : vector<1x16x128xf32> to vector<1x16x128xbf16>
    %c0_46 = arith.constant 0 : index
    %c16_47 = arith.constant 16 : index
    %c0_48 = arith.constant 0 : index
    %63 = vector.load %arg18[%c0_46, %c16_47, %c0_48] : memref<1x48x128xbf16, #tpu.memory_space<vmem>>, vector<1x16x128xbf16>
    tpu.vector_store %arg18[%c0_46, %c16_47, %c0_48], %62 {strides = array<i32>} : memref<1x48x128xbf16, #tpu.memory_space<vmem>>, vector<1x16x128xbf16>,
    %c0_49 = arith.constant 0 : index
    %c14 = arith.constant 14 : index
    %c0_50 = arith.constant 0 : index
    %64 = vector.load %arg18[%c0_49, %c14, %c0_50] : memref<1x48x128xbf16, #tpu.memory_space<vmem>>, vector<1x16x128xbf16>
    %c0_51 = arith.constant 0 : index
    %c15_52 = arith.constant 15 : index
    %c0_53 = arith.constant 0 : index
    %65 = vector.load %arg18[%c0_51, %c15_52, %c0_53] : memref<1x48x128xbf16, #tpu.memory_space<vmem>>, vector<1x16x128xbf16>
    %c0_54 = arith.constant 0 : index
    %c16_55 = arith.constant 16 : index
    %c0_56 = arith.constant 0 : index
    %66 = vector.load %arg18[%c0_54, %c16_55, %c0_56] : memref<1x48x128xbf16, #tpu.memory_space<vmem>>, vector<1x16x128xbf16>
    %c0_57 = arith.constant 0 : index
    %c17_58 = arith.constant 17 : index
    %c0_59 = arith.constant 0 : index
    %67 = vector.load %arg18[%c0_57, %c17_58, %c0_59] : memref<1x48x128xbf16, #tpu.memory_space<vmem>>, vector<1x16x128xbf16>
    %c0_60 = arith.constant 0 : index
    %c18 = arith.constant 18 : index
    %c0_61 = arith.constant 0 : index
    %68 = vector.load %arg18[%c0_60, %c18, %c0_61] : memref<1x48x128xbf16, #tpu.memory_space<vmem>>, vector<1x16x128xbf16>
    %69 = tpu.concatenate %64, %65, %66, %67, %68 in 2 : vector<1x16x128xbf16>, vector<1x16x128xbf16>, vector<1x16x128xbf16>, vector<1x16x128xbf16>, vector<1x16x128xbf16> -> vector<1x16x640xbf16>
    %70 = vector.shape_cast %69 : vector<1x16x640xbf16> to vector<16x640xbf16>
    %c0_62 = arith.constant 0 : index
    %c0_63 = arith.constant 0 : index
    %71 = vector.load %arg11[%c0_62, %c0_63] : memref<640x256xbf16, #tpu.memory_space<vmem>>, vector<640x256xbf16>
    %cst_64 = arith.constant dense<0.000000e+00> : vector<16x256xf32>
    %72 = tpu.matmul %70, %71, %cst_64 {dimension_numbers = #tpu.dot_dimension_numbers<[1], [0], [0], [1], [0, 0, 1, 1], [], []>} : vector<16x640xbf16>, vector<640x256xbf16>, vector<16x256xf32> -> vector<16x256xf32>
    %c0_65 = arith.constant 0 : index
    %c0_66 = arith.constant 0 : index
    %73 = vector.load %arg12[%c0_65, %c0_66] : memref<1x256xf32, #tpu.memory_space<vmem>>, vector<1x256xf32>
    %74 = vector.broadcast %73 : vector<1x256xf32> to vector<16x256xf32>
    %75 = arith.addf %72, %74 : vector<16x256xf32>
    %76 = vector.extract_strided_slice %75 {offsets = [0, 0], sizes = [16, 128], strides = [1, 1]} : vector<16x256xf32> to vector<16x128xf32>
    %77 = vector.extract_strided_slice %75 {offsets = [0, 128], sizes = [16, 128], strides = [1, 1]} : vector<16x256xf32> to vector<16x128xf32>
    %78 = arith.negf %77 : vector<16x128xf32>
    %79 = math.exp %78 : vector<16x128xf32>
    %cst_67 = arith.constant 1.000000e+00 : f32
    %80 = vector.broadcast %cst_67 : f32 to vector<16x128xf32>
    %81 = arith.addf %80, %79 : vector<16x128xf32>
    %82 = arith.divf %80, %81 : vector<16x128xf32>
    %83 = arith.mulf %76, %82 : vector<16x128xf32>
    %84 = arith.addf %83, %60 : vector<16x128xf32>
    %cst_68 = arith.constant 0.707106769 : f32
    %85 = vector.broadcast %cst_68 : f32 to vector<16x128xf32>
    %86 = arith.mulf %84, %85 : vector<16x128xf32>
    %87 = vector.shape_cast %86 : vector<16x128xf32> to vector<1x16x128xf32>
    %88 = arith.truncf %87 : vector<1x16x128xf32> to vector<1x16x128xbf16>
    "tpu.trace_start"() <{level = 10 : i32, message = "bij,bjc->bic"}> : () -> ()
    %cst_69 = arith.constant dense<0.000000e+00> : vector<1x16x128xf32>
    %89 = tpu.matmul %12, %88, %cst_69 {dimension_numbers = #tpu.dot_dimension_numbers<[2], [1], [1], [2], [0, 0, 0, 1, 1, 2], [0], [0]>} : vector<1x16x16xbf16>, vector<1x16x128xbf16>, vector<1x16x128xf32> -> vector<1x16x128xf32>
    "tpu.trace_stop"() : () -> ()
    %90 = arith.addf %87, %89 : vector<1x16x128xf32>
    %91 = vector.shape_cast %90 : vector<1x16x128xf32> to vector<16x128xf32>
    %92 = arith.truncf %91 : vector<16x128xf32> to vector<16x128xbf16>
    %c0_70 = arith.constant 0 : index
    %c0_71 = arith.constant 0 : index
    %93 = vector.load %arg13[%c0_70, %c0_71] : memref<128x128xbf16, #tpu.memory_space<vmem>>, vector<128x128xbf16>
    %cst_72 = arith.constant dense<0.000000e+00> : vector<16x128xf32>
    %94 = tpu.matmul %92, %93, %cst_72 {dimension_numbers = #tpu.dot_dimension_numbers<[1], [0], [0], [1], [0, 0, 1, 1], [], []>} : vector<16x128xbf16>, vector<128x128xbf16>, vector<16x128xf32> -> vector<16x128xf32>
    %c0_73 = arith.constant 0 : index
    %c0_74 = arith.constant 0 : index
    %95 = vector.load %arg14[%c0_73, %c0_74] : memref<1x128xf32, #tpu.memory_space<vmem>>, vector<1x128xf32>
    %96 = vector.broadcast %95 : vector<1x128xf32> to vector<16x128xf32>
    %97 = arith.addf %94, %96 : vector<16x128xf32>
    %cst_75 = arith.constant 0.000000e+00 : f32
    %98 = vector.broadcast %cst_75 : f32 to vector<16x128xf32>
    %99 = arith.maximumf %97, %98 : vector<16x128xf32>
    %100 = arith.truncf %99 : vector<16x128xf32> to vector<16x128xbf16>
    %c0_76 = arith.constant 0 : index
    %c0_77 = arith.constant 0 : index
    %101 = vector.load %arg15[%c0_76, %c0_77] : memref<128x128xbf16, #tpu.memory_space<vmem>>, vector<128x128xbf16>
    %cst_78 = arith.constant dense<0.000000e+00> : vector<16x128xf32>
    %102 = tpu.matmul %100, %101, %cst_78 {dimension_numbers = #tpu.dot_dimension_numbers<[1], [0], [0], [1], [0, 0, 1, 1], [], []>} : vector<16x128xbf16>, vector<128x128xbf16>, vector<16x128xf32> -> vector<16x128xf32>
    %c0_79 = arith.constant 0 : index
    %c0_80 = arith.constant 0 : index
    %103 = vector.load %arg16[%c0_79, %c0_80] : memref<1x128xf32, #tpu.memory_space<vmem>>, vector<1x128xf32>
    %104 = vector.broadcast %103 : vector<1x128xf32> to vector<16x128xf32>
    %105 = arith.addf %102, %104 : vector<16x128xf32>
    %cst_81 = arith.constant 0.000000e+00 : f32
    %106 = vector.broadcast %cst_81 : f32 to vector<16x128xf32>
    %107 = arith.maximumf %105, %106 : vector<16x128xf32>
    %108 = arith.addf %107, %86 : vector<16x128xf32>
    %cst_82 = arith.constant 0.707106769 : f32
    %109 = vector.broadcast %cst_82 : f32 to vector<16x128xf32>
    %110 = arith.mulf %108, %109 : vector<16x128xf32>
    %111 = vector.shape_cast %110 : vector<16x128xf32> to vector<1x16x128xf32>
    %c0_83 = arith.constant 0 : index
    %c0_84 = arith.constant 0 : index
    %c0_85 = arith.constant 0 : index
    %112 = vector.load %arg17[%c0_83, %c0_84, %c0_85] : memref<1x16x128xf32, #tpu.memory_space<vmem>>, vector<1x16x128xf32>
    tpu.vector_store %arg17[%c0_83, %c0_84, %c0_85], %111 {strides = array<i32>} : memref<1x16x128xf32, #tpu.memory_space<vmem>>, vector<1x16x128xf32>,
    return
  }
  func.func @transform_0(%arg0: i32) -> (i32, i32, i32) {
    %c0_i32 = arith.constant 0 : i32
    %c0_i32_0 = arith.constant 0 : i32
    %c0_i32_1 = arith.constant 0 : i32
    return %arg0, %c0_i32, %c0_i32_0 : i32, i32, i32
  }
  func.func @transform_1(%arg0: i32) -> (i32, i32, i32) {
    %c0_i32 = arith.constant 0 : i32
    %c0_i32_0 = arith.constant 0 : i32
    %c0_i32_1 = arith.constant 0 : i32
    return %arg0, %c0_i32, %c0_i32_0 : i32, i32, i32
  }
  func.func @transform_2(%arg0: i32) -> (i32, i32) {
    %c0_i32 = arith.constant 0 : i32
    %c0_i32_0 = arith.constant 0 : i32
    %c0_i32_1 = arith.constant 0 : i32
    return %c0_i32, %c0_i32_0 : i32, i32
  }
  func.func @transform_3(%arg0: i32) -> (i32, i32) {
    %c0_i32 = arith.constant 0 : i32
    %c0_i32_0 = arith.constant 0 : i32
    %c0_i32_1 = arith.constant 0 : i32
    return %c0_i32, %c0_i32_0 : i32, i32
  }
  func.func @transform_4(%arg0: i32) -> (i32, i32) {
    %c0_i32 = arith.constant 0 : i32
    %c0_i32_0 = arith.constant 0 : i32
    %c0_i32_1 = arith.constant 0 : i32
    return %c0_i32, %c0_i32_0 : i32, i32
  }
  func.func @transform_5(%arg0: i32) -> (i32, i32) {
    %c0_i32 = arith.constant 0 : i32
    %c0_i32_0 = arith.constant 0 : i32
    %c0_i32_1 = arith.constant 0 : i32
    return %c0_i32, %c0_i32_0 : i32, i32
  }
  func.func @transform_6(%arg0: i32) -> (i32, i32) {
    %c0_i32 = arith.constant 0 : i32
    %c0_i32_0 = arith.constant 0 : i32
    %c0_i32_1 = arith.constant 0 : i32
    return %c0_i32, %c0_i32_0 : i32, i32
  }
  func.func @transform_7(%arg0: i32) -> (i32, i32) {
    %c0_i32 = arith.constant 0 : i32
    %c0_i32_0 = arith.constant 0 : i32
    %c0_i32_1 = arith.constant 0 : i32
    return %c0_i32, %c0_i32_0 : i32, i32
  }
  func.func @transform_8(%arg0: i32) -> (i32, i32) {
    %c0_i32 = arith.constant 0 : i32
    %c0_i32_0 = arith.constant 0 : i32
    %c0_i32_1 = arith.constant 0 : i32
    return %c0_i32, %c0_i32_0 : i32, i32
  }
  func.func @transform_9(%arg0: i32) -> (i32, i32) {
    %c0_i32 = arith.constant 0 : i32
    %c0_i32_0 = arith.constant 0 : i32
    %c0_i32_1 = arith.constant 0 : i32
    return %c0_i32, %c0_i32_0 : i32, i32
  }
  func.func @transform_10(%arg0: i32) -> (i32, i32) {
    %c0_i32 = arith.constant 0 : i32
    %c0_i32_0 = arith.constant 0 : i32
    %c0_i32_1 = arith.constant 0 : i32
    return %c0_i32, %c0_i32_0 : i32, i32
  }
  func.func @transform_11(%arg0: i32) -> (i32, i32) {
    %c0_i32 = arith.constant 0 : i32
    %c0_i32_0 = arith.constant 0 : i32
    %c0_i32_1 = arith.constant 0 : i32
    return %c0_i32, %c0_i32_0 : i32, i32
  }
  func.func @transform_12(%arg0: i32) -> (i32, i32) {
    %c0_i32 = arith.constant 0 : i32
    %c0_i32_0 = arith.constant 0 : i32
    %c0_i32_1 = arith.constant 0 : i32
    return %c0_i32, %c0_i32_0 : i32, i32
  }
  func.func @transform_13(%arg0: i32) -> (i32, i32) {
    %c0_i32 = arith.constant 0 : i32
    %c0_i32_0 = arith.constant 0 : i32
    %c0_i32_1 = arith.constant 0 : i32
    return %c0_i32, %c0_i32_0 : i32, i32
  }
  func.func @transform_14(%arg0: i32) -> (i32, i32) {
    %c0_i32 = arith.constant 0 : i32
    %c0_i32_0 = arith.constant 0 : i32
    %c0_i32_1 = arith.constant 0 : i32
    return %c0_i32, %c0_i32_0 : i32, i32
  }
  func.func @transform_15(%arg0: i32) -> (i32, i32) {
    %c0_i32 = arith.constant 0 : i32
    %c0_i32_0 = arith.constant 0 : i32
    %c0_i32_1 = arith.constant 0 : i32
    return %c0_i32, %c0_i32_0 : i32, i32
  }
  func.func @transform_16(%arg0: i32) -> (i32, i32, i32) {
    %c0_i32 = arith.constant 0 : i32
    %c0_i32_0 = arith.constant 0 : i32
    %c0_i32_1 = arith.constant 0 : i32
    return %arg0, %c0_i32, %c0_i32_0 : i32, i32, i32
  }
}

</mosaic_0001>

<bundles_post_ra>
// kernel: tpu_custom_call.1
= control target key start
LH: loop header
LB: loop body
LE: loop exit
PB: predicated region body
PF: predicated region fallthrough
CT: control target
= control target key end

     0   :  { %s4218_s0 = inlined_call_operand.vmem [shape: f32[2,16,8], index: 0, kind: input, shape index: {}]   ;;  %s4219_s1 = inlined_call_operand.hbm [shape: bf16[2,16,16], index: 1, kind: input, shape index: {}]   ;;  %s4220_s2 = inlined_call_operand.vmem [shape: bf16[8,128], index: 2, kind: input, shape index: {}]   ;;  %s4221_s3 = inlined_call_operand.hbm [shape: f32[1,128], index: 3, kind: input, shape index: {}]   ;;  %s4222_s4 = inlined_call_operand.hbm [shape: bf16[384,256], index: 4, kind: input, shape index: {}]   ;;  %s4223_s5 = inlined_call_operand.vmem [shape: f32[1,256], index: 5, kind: input, shape index: {}]   ;;  %s4224_s6 = inlined_call_operand.vmem [shape: bf16[128,128], index: 6, kind: input, shape index: {}]   ;;  %s4225_s7 = inlined_call_operand.vmem [shape: f32[1,128], index: 7, kind: input, shape index: {}]   ;;  %s4226_s8 = inlined_call_operand.hbm [shape: bf16[128,128], index: 8, kind: input, shape index: {}]   ;;  %s4227_s9 = inlined_call_operand.vmem [shape: f32[1,128], index: 9, kind: input, shape index: {}]   ;;  %s4228_s10 = inlined_call_operand.hbm [shape: bf16[640,256], index: 10, kind: input, shape index: {}]   ;;  %s4229_s11 = inlined_call_operand.vmem [shape: f32[1,256], index: 11, kind: input, shape index: {}]   ;;  %s4230_s12 = inlined_call_operand.hbm [shape: bf16[128,128], index: 12, kind: input, shape index: {}]   ;;  %s4231_s13 = inlined_call_operand.vmem [shape: f32[1,128], index: 13, kind: input, shape index: {}]   ;;  %s4232_s14 = inlined_call_operand.hbm [shape: bf16[128,128], index: 14, kind: input, shape index: {}]   ;;  %s4233_s15 = inlined_call_operand.vmem [shape: f32[1,128], index: 15, kind: input, shape index: {}]   ;;  %s4234_s16 = inlined_call_operand.hbm [shape: f32[2,16,128], index: 16, kind: output, shape index: {}]  }
   0x1   :  { %4243 = sst [smem:[#allocation21_spill]] %s4218_s0 }
   0x2   :  { %4244 = sst [smem:[#allocation22_spill]] %s4221_s3 }
   0x3   :  { %4245 = sst [smem:[#allocation23_spill]] %s4222_s4 }
   0x4   :  { %4246 = sst [smem:[#allocation24_spill]] %s4226_s8 }
   0x5   :  { %4247 = sst [smem:[#allocation25_spill]] %s4227_s9 }
   0x6   :  { %4248 = sst [smem:[#allocation26_spill]] %s4228_s10 }
   0x7   :  { %4249 = sst [smem:[#allocation27_spill]] %s4229_s11 }
   0x8   :  { %4250 = sst [smem:[#allocation28_spill]] %s4231_s13 }
   0x9   :  { %4251 = sst [smem:[#allocation29_spill]] %s4233_s15 }
   0xa   :  { %4252 = sst [smem:[#allocation30_spill]] %s4234_s16 }
   0xb   :  { %21 = vsyncpa [#allocation4], 0 }
   0xc   :  { %23 = vsyncpa [#allocation4 + $0x1], 0 }
   0xd   :  { %24 = vsyncpa [#allocation7], 0 }
   0xe   :  { %25 = vsyncpa [#allocation10], 0 }
   0xf   :  { %26 = vsyncpa [#allocation13], 0 }
  0x10   :  { %27 = vsyncpa [#allocation5], 0 }
  0x11   :  { %29 = vsyncpa [#allocation5 + $0x1], 0  ;;  %s3696_s21 = smov 0   ;;  %s3698_s22 = smov 0  }
  0x12   :  { %s3700_s23 = smov 0   ;;  %s3702_s24 = smov 0  }
  0x13 LB: > { %s3594_s25 = smov [#allocation6]   ;;  %s3717_s27 = sadd.s32 4294967295, %s3592_s24   ;;  %s3592_s24 = sphi %s3702_s24, %s4287_s24   ;;  %s3588_s23 = sphi %s3700_s23, %s4286_s23   ;;  %s3584_s22 = sphi %s3698_s22, %s4285_s22   ;;  %s3580_s21 = sphi %s3696_s21, %s4284_s21  }
  0x14   : > { %s428_s26 = sshll.u32 %s3594_s25, 4  ;;  %p2595_p0 = scmp.ge.s32.totalorder %s3592_s24, 1  ;;  %s3722_s26 = int_to_ptr.vmem [resolvable:$true] %s428_s26 }
  0x15   : > { %p4236_p1 = scmp.eq.s32.totalorder %s3717_s27, 0  ;;  %p412_p2 = scmp.lt.s32.totalorder %s3592_s24, 3 }
  0x16   : > { %s3595_s29 = smov [#allocation9]   ;;  %s3596_s17 = smov [#allocation12]  }
  0x17   : > { %p3724_p3 = pnand %p2595_p0, %p412_p2  ;;  %s460_s30 = sshll.u32 %s3595_s29, 4  ;;  %s3731_s30 = int_to_ptr.vmem [resolvable:$true] %s460_s30 }
  0x18   : > { %s492_s18 = sshll.u32 %s3596_s17, 4  ;;  %s4255_s3 = sld [smem:[#allocation22_spill]]  ;;  %s3739_s18 = int_to_ptr.vmem [resolvable:$true] %s492_s18 }
  0x19   : > { %s4253_s28 = scalar_select %p3724_p3, 1, 0 }
  0x1a   : > { %p2987_p5 = pneg %p3724_p3 }
  0x1c   : > { %p3735_p6 = pnand %p2987_p5, %p4236_p1 }
  0x1e   : > { %s3316_s25 = scalar_lea.hbm %s4255_s3, 16  ;;  %p3749_p8 = pneg %p3735_p6 }
  0x1f   : > { %p3317_p7 = scmp.ne.s32.totalorder %s4255_s3, %s3316_s25  ;;  %p3323_p11 = scmp.lt.u32.totalorder %s3316_s25, %s4255_s3 }
  0x21   : > { %p3319_p9 = pnand %p3749_p8, %p3317_p7 }
  0x23   : > { %p3320_p10 = pneg %p3319_p9 }
  0x25   : > { %p3325_p12 = pnand %p3323_p11, %p3320_p10 }
  0x27   : > { %3328 = shalt.err (!%p3325_p12)
}
  0x28   : > { %s3329_s15 = scalar_lea.vmem %s3722_s26, 16  ;;  %s3336_s16 = scalar_lea.vmem %s3722_s26, 32 }
  0x29   : > { %p3330_p13 = scmp.ne.s32.totalorder %s3722_s26, %s3329_s15  ;;  %p3337_p5 = scmp.lt.s32.totalorder %s3722_s26, %s3722_s26 }
  0x2a   : > { %p3338_p7 = scmp.lt.s32.totalorder %s3336_s16, %s3329_s15 }
  0x2b   : > { %p3332_p0 = pnand %p3330_p13, %p3749_p8 }
  0x2c   : > { %p3339_p9 = por %p3338_p7, %p3337_p5 }
  0x2d   : > { %p3333_p2 = pneg %p3332_p0 }
  0x2f   : > { %p3340_p4 = pnand %p3339_p9, %p3333_p2 }
  0x31   : > { %3343 = shalt.err (!%p3340_p4)
}
  0x32   : > { %2990 = dma.hbm_to_vmem [thread:$0]  (!%p3735_p6), %s4255_s3, 16, %s3722_s26, [#allocation7]  }
  0x33   : > { %s4257_s8 = sld [smem:[#allocation24_spill]] }
  0x39   : > { %s3344_s17 = scalar_lea.hbm %s4257_s8, 1024 }
  0x3a   : > { %p3345_p10 = scmp.ne.s32.totalorder %s4257_s8, %s3344_s17  ;;  %p3351_p4 = scmp.lt.u32.totalorder %s3344_s17, %s4257_s8 }
  0x3c   : > { %p3347_p11 = pnand %p3345_p10, %p3749_p8 }
  0x3e   : > { %p3348_p12 = pneg %p3347_p11 }
  0x40   : > { %p3353_p13 = pnand %p3351_p4, %p3348_p12 }
  0x42   : > { %3356 = shalt.err (!%p3353_p13)
}
  0x43   : > { %s3357_s26 = scalar_lea.vmem %s3731_s30, 1024  ;;  %p3365_p7 = scmp.lt.s32.totalorder %s3731_s30, %s3731_s30 }
  0x44   : > { %p3358_p0 = scmp.ne.s32.totalorder %s3731_s30, %s3357_s26  ;;  %p3366_p9 = scmp.lt.s32.totalorder %s3357_s26, %s3357_s26 }
  0x46   : > { %p3360_p2 = pnand %p3358_p0, %p3749_p8  ;;  %p3367_p10 = por %p3366_p9, %p3365_p7 }
  0x48   : > { %p3361_p5 = pneg %p3360_p2 }
  0x4a   : > { %p3368_p11 = pnand %p3367_p10, %p3361_p5 }
  0x4c   : > { %3371 = shalt.err (!%p3368_p11)
}
  0x4d   : > { %s4238_s9 = smov 64   ;;  %s4240_s11 = smov 4  }
  0x4e   : > { %2996 = dma.hbm_to_vmem [thread:$0]  (!%p3735_p6), %s4257_s8, 1024, %s3731_s30, [#allocation10], %s4238_s9, %s4238_s9, %s4240_s11  }
  0x4f   : > { %s3372_s17 = scalar_lea.hbm %s4230_s12, 1024 }
  0x50   : > { %p3373_p12 = scmp.ne.s32.totalorder %s4230_s12, %s3372_s17  ;;  %p3379_p0 = scmp.lt.u32.totalorder %s3372_s17, %s4230_s12 }
  0x52   : > { %p3375_p4 = pnand %p3373_p12, %p3749_p8 }
  0x54   : > { %p3376_p13 = pneg %p3375_p4 }
  0x56   : > { %p3381_p2 = pnand %p3379_p0, %p3376_p13 }
  0x58   : > { %3384 = shalt.err (!%p3381_p2)
}
  0x59   : > { %s3385_s30 = scalar_lea.vmem %s3739_s18, 1024  ;;  %p3393_p10 = scmp.lt.s32.totalorder %s3739_s18, %s3739_s18 }
  0x5a   : > { %p3386_p5 = scmp.ne.s32.totalorder %s3739_s18, %s3385_s30  ;;  %p3394_p11 = scmp.lt.s32.totalorder %s3385_s30, %s3385_s30 }
  0x5c   : > { %p3388_p7 = pnand %p3386_p5, %p3749_p8  ;;  %p3395_p12 = por %p3394_p11, %p3393_p10 }
  0x5e   : > { %p3389_p9 = pneg %p3388_p7 }
  0x60   : > { %p3396_p4 = pnand %p3395_p12, %p3389_p9 }
  0x62   : > { %3399 = shalt.err (!%p3396_p4)
}
  0x63   : > { %3002 = dma.hbm_to_vmem [thread:$0]  (!%p3735_p6), %s4230_s12, 1024, %s3739_s18, [#allocation13], %s4238_s9, %s4238_s9, %s4240_s11  }
  0x64   : > { %s3599_s19 = smov [#allocation8]   ;;  %s4258_s4 = sld [smem:[#allocation23_spill]] }
  0x65   : > { %s438_s20 = sshll.u32 %s3599_s19, 4  ;;  %s439_s20 = int_to_ptr.vmem [resolvable:$true] %s438_s20 }
  0x6a   : > { %s3400_s15 = scalar_lea.hbm %s4258_s4, 6144 }
  0x6b   : > { %p3401_p13 = scmp.ne.s32.totalorder %s4258_s4, %s3400_s15  ;;  %p3407_p5 = scmp.lt.u32.totalorder %s3400_s15, %s4258_s4 }
  0x6d   : > { %p3403_p0 = pnand %p3401_p13, %p3749_p8 }
  0x6f   : > { %p3404_p2 = pneg %p3403_p0 }
  0x71   : > { %p3409_p7 = pnand %p3407_p5, %p3404_p2 }
  0x73   : > { %3412 = shalt.err (!%p3409_p7)
}
  0x74   : > { %s3413_s18 = scalar_lea.vmem %s439_s20, 6144  ;;  %p3421_p12 = scmp.lt.s32.totalorder %s439_s20, %s439_s20 }
  0x75   : > { %p3414_p9 = scmp.ne.s32.totalorder %s439_s20, %s3413_s18  ;;  %p3422_p4 = scmp.lt.s32.totalorder %s3413_s18, %s3413_s18 }
  0x77   : > { %p3416_p10 = pnand %p3414_p9, %p3749_p8  ;;  %p3423_p1 = por %p3422_p4, %p3421_p12 }
  0x79   : > { %p3417_p11 = pneg %p3416_p10 }
  0x7b   : > { %p3424_p3 = pnand %p3423_p1, %p3417_p11 }
  0x7d   : > { %3427 = shalt.err (!%p3424_p3)
}
  0x7e   : > { %s3600_s3 = smov 128   ;;  %s3601_s13 = smov 8  }
  0x7f   : > { %2993 = dma.hbm_to_vmem [thread:$0]  (!%p3735_p6), %s4258_s4, 6144, %s439_s20, [#allocation7], %s3600_s3, %s3600_s3, %s3601_s13  }
  0x80   : > { %s3602_s25 = smov [#allocation11]   ;;  %s3603_s15 = smov [#allocation14]  }
  0x81   : > { %s476_s17 = sshll.u32 %s3602_s25, 4  ;;  %s508_s16 = sshll.u32 %s3603_s15, 4  ;;  %s477_s17 = int_to_ptr.vmem [resolvable:$true] %s476_s17  ;;  %s3841_s16 = int_to_ptr.vmem [resolvable:$true] %s508_s16 }
  0x82   : > { %s4259_s10 = sld [smem:[#allocation26_spill]] }
  0x88   : > { %s3428_s18 = scalar_lea.hbm %s4259_s10, 10240 }
  0x89   : > { %p3429_p1 = scmp.ne.s32.totalorder %s4259_s10, %s3428_s18  ;;  %p3435_p0 = scmp.lt.u32.totalorder %s3428_s18, %s4259_s10 }
  0x8b   : > { %p3431_p3 = pnand %p3429_p1, %p3749_p8 }
  0x8d   : > { %p3432_p13 = pneg %p3431_p3 }
  0x8f   : > { %p3437_p2 = pnand %p3435_p0, %p3432_p13 }
  0x91   : > { %3440 = shalt.err (!%p3437_p2)
}
  0x92   : > { %s3441_s19 = scalar_lea.vmem %s477_s17, 10240  ;;  %p3449_p10 = scmp.lt.s32.totalorder %s477_s17, %s477_s17 }
  0x93   : > { %p3442_p5 = scmp.ne.s32.totalorder %s477_s17, %s3441_s19  ;;  %p3450_p11 = scmp.lt.s32.totalorder %s3441_s19, %s3441_s19 }
  0x95   : > { %p3444_p7 = pnand %p3442_p5, %p3749_p8  ;;  %p3451_p12 = por %p3450_p11, %p3449_p10 }
  0x97   : > { %p3445_p9 = pneg %p3444_p7 }
  0x99   : > { %p3452_p4 = pnand %p3451_p12, %p3445_p9 }
  0x9b   : > { %3455 = shalt.err (!%p3452_p4)
}
  0x9c   : > { %2999 = dma.hbm_to_vmem [thread:$0]  (!%p3735_p6), %s4259_s10, 10240, %s477_s17, [#allocation10], %s3600_s3, %s3600_s3, %s3601_s13  }
  0x9d   : > { %s3456_s26 = scalar_lea.hbm %s4232_s14, 1024 }
  0x9e   : > { %p3457_p1 = scmp.ne.s32.totalorder %s4232_s14, %s3456_s26  ;;  %p3463_p0 = scmp.lt.u32.totalorder %s3456_s26, %s4232_s14 }
  0xa0   : > { %p3459_p3 = pnand %p3457_p1, %p3749_p8 }
  0xa2   : > { %p3460_p13 = pneg %p3459_p3 }
  0xa4   : > { %p3465_p2 = pnand %p3463_p0, %p3460_p13 }
  0xa6   : > { %3468 = shalt.err (!%p3465_p2)
}
  0xa7   : > { %s3469_s3 = scalar_lea.vmem %s3841_s16, 1024  ;;  %p3477_p10 = scmp.lt.s32.totalorder %s3841_s16, %s3841_s16 }
  0xa8   : > { %p3470_p5 = scmp.ne.s32.totalorder %s3841_s16, %s3469_s3  ;;  %p3478_p11 = scmp.lt.s32.totalorder %s3469_s3, %s3469_s3 }
  0xaa   : > { %p3472_p7 = pnand %p3470_p5, %p3749_p8  ;;  %p3479_p12 = por %p3478_p11, %p3477_p10 }
  0xac   : > { %p3473_p9 = pneg %p3472_p7 }
  0xae   : > { %p3480_p4 = pnand %p3479_p12, %p3473_p9 }
  0xb0   : > { %3483 = shalt.err (!%p3480_p4)
}
  0xb1   : > { %s4260_s13 = smov 4   ;;  %s4261_s17 = smov 64  }
  0xb2   : > { %3005 = dma.hbm_to_vmem [thread:$0]  (!%p3735_p6), %s4232_s14, 1024, %s3841_s16, [#allocation13], %s4261_s17, %s4261_s17, %s4260_s13  }
  0xb3   : > { %s2594_s0 = sadd.s32 4294967294, %s3592_s24   ;;  %s3889_s29 = sadd.s32 1, %s3592_s24  }
  0xb4   : > { %s65_s11 = ssub.s32 %s3592_s24, %s3889_s29  ;;  %s68_s25 = sadd.s32 1, %s3588_s23 }
  0xb5   : > { %p66_p8 = scmp.eq.s32.totalorder %s65_s11, 0  ;;  %p75_p1 = scmp.ne.s32.totalorder %s3588_s23, %s3584_s22 }
  0xb6   : > { %p76_p3 = scmp.eq.s32.totalorder %s3592_s24, 0  ;;  %p81_p13 = scmp.ne.s32.totalorder %s3584_s22, %s3580_s21 }
  0xb7   : > { %s3900_s15 = scalar_select %p66_p8, %s3588_s23, %s68_s25  }
  0xb8   : > { %p3902_p0 = por %p76_p3, %p75_p1  ;;  %p4263_p2 = scmp.eq.s32.totalorder %s3717_s27, 0 }
  0xb9   : > { %p399_p5 = scmp.eq.s32.totalorder %s3717_s27, 1  ;;  %p405_p7 = scmp.eq.s32.totalorder %s2594_s0, 1 }
  0xba   : > { %p3908_p6 = por %p4263_p2, %p81_p13  ;;  %p3020_p9 = scmp.lt.s32.totalorder %s3592_s24, 2 }
  0xbb   : > { %s533_s30 = sand.u32 1, %s3588_s23   ;;  %p3915_p10 = por %p399_p5, %p75_p1 }
  0xbc   : > { %p3919_p11 = por %p405_p7, %p81_p13  ;;  %s2603_s20 = sshll.u32 %s533_s30, 3 }
  0xbd   : > { %s4265_s18 = scalar_select %p3915_p10, 1, 0 }
  0xbe   : > { %s4266_s8 = scalar_select %p3919_p11, 1, 0 }
  0xbf   : > { %s2796_s3 = sshll.u32 %s3592_s24, 7  ;;  %s537_s0 = scalar_lea.vmem [#allocation3], %s2603_s20 }
  0xc0   : > { %s3927_s11 = scalar_lea.hbm %s4219_s1, %s2796_s3  ;;  %s544_s25 = sshll.u32 %s537_s0, 4  ;;  %s3929_s25 = int_to_ptr.vmem [resolvable:$true] %s544_s25 }
  0xc1   : > { %p3933_p12 = pnand %p3020_p9, %p3902_p0  ;;  %s3937_s10 = scalar_lea.sflag [#allocation4], %s533_s30 }
  0xc2   : > { %s3484_s19 = scalar_lea.hbm %s3927_s11, 128  ;;  %s3489_s26 = scalar_lea.hbm %s4219_s1, 256 }
  0xc3   : > { %p3485_p4 = scmp.ne.s32.totalorder %s3927_s11, %s3484_s19  ;;  %p3486_p8 = pneg %p3933_p12 }
  0xc4   : > { %p3490_p13 = scmp.lt.u32.totalorder %s3927_s11, %s4219_s1  ;;  %p3491_p0 = scmp.lt.u32.totalorder %s3489_s26, %s3484_s19 }
  0xc5   : > { %p3487_p1 = pnand %p3486_p8, %p3485_p4  ;;  %p3493_p5 = scmp.lt.u32.totalorder %s3484_s19, %s3927_s11 }
  0xc6   : > { %p3492_p2 = por %p3491_p0, %p3490_p13 }
  0xc7   : > { %p3488_p3 = pneg %p3487_p1 }
  0xc8   : > { %p3494_p7 = por %p3493_p5, %p3492_p2 }
  0xca   : > { %p3495_p9 = pnand %p3494_p7, %p3488_p3 }
  0xcc   : > { %3498 = shalt.err (!%p3495_p9)
}
  0xcd   : > { %s3499_s30 = scalar_lea.vmem %s3929_s25, 128  ;;  %s3604_s20 = smov [#allocation3]  }
  0xce   : > { %p3500_p4 = scmp.ne.s32.totalorder %s3929_s25, %s3499_s30  ;;  %s3504_s3 = sshll.u32 %s3604_s20, 4  ;;  %s3505_s3 = int_to_ptr.vmem [resolvable:$false] %s3504_s3 }
  0xcf   : > { %s3506_s9 = scalar_lea.vmem %s3505_s3, 256  ;;  %p3507_p10 = scmp.lt.s32.totalorder %s3929_s25, %s3505_s3 }
  0xd0   : > { %p3502_p1 = pnand %p3500_p4, %p3486_p8  ;;  %p3508_p13 = scmp.lt.s32.totalorder %s3506_s9, %s3499_s30 }
  0xd2   : > { %p3503_p11 = pneg %p3502_p1  ;;  %p3509_p0 = por %p3508_p13, %p3507_p10 }
  0xd4   : > { %p3510_p2 = pnand %p3509_p0, %p3503_p11 }
  0xd6   : > { %3513 = shalt.err (!%p3510_p2)
}
  0xd7   : > { %3009 = dma.hbm_to_vmem [thread:$0]  (!%p3933_p12), %s3927_s11, 128, %s3929_s25, %s3937_s10, %s4261_s17, %s4261_s17, %s4260_s13  }
  0xd8   : > { %p4268_p8 = scmp.ne.s32.totalorder %s4253_s28, 0 }
  0xd9   : > { %s3971_s19 = sand.u32 (!%p4268_p8), 1, %s3584_s22  }
  0xda   : > { %556 = sbr.rel (%p4268_p8) target bundleno = 2463 (0x99f), region = 84  ;;  %s2607_s26 = sshll.u32 (!%p4268_p8), %s3971_s19, 3 }
  0xdb   : > { %s559_s0 = scalar_lea.sflag (!%p4268_p8), [#allocation4], %s3971_s19  ;;  %s3975_s30 = scalar_lea.vmem (!%p4268_p8), [#allocation3], %s2607_s26 }
  0xe1   : > { %3559 = dma.done.wait (%p3908_p6), %s559_s0, 128  }
  0xe2   : > { %3561 = vsyncadd (%p3908_p6), %s559_s0, 4294967168  ;;  %p4269_p10 = scmp.eq.s32.totalorder %s3717_s27, 0 }
  0xe4   : > { %3563 = dma.done.wait (%p4269_p10), [#allocation7], 6160   ;;  %p4270_p11 = pmov %p4269_p10 }
  0xe5   : > { %p4271_p12 = pmov %p4269_p10 }
  0xe6   : > { %3565 = vsyncadd (%p4270_p11), [#allocation7], 4294961136 }
  0xe7   : > { %3567 = dma.done.wait (%p4271_p12), [#allocation10], 11264   ;;  %p4272_p3 = pmov %p4269_p10 }
  0xe9   : > { %3569 = vsyncadd (%p4272_p3), [#allocation10], 4294956032  ;;  %p4273_p5 = pmov %p4272_p3 }
  0xea   : > { %p4274_p7 = pmov %p4272_p3 }
  0xeb   : > { %3571 = dma.done.wait (%p4273_p5), [#allocation13], 2048  }
  0xec   : > { %3573 = vsyncadd (%p4274_p7), [#allocation13], 4294965248  ;;  %p640_p6 = scmp.lt.s32.totalorder %s3717_s27, 1  ;;  %v3605_v0 = vmov 0.0   ;;  %vm3606_vm0 = vmmov 0   ;;  %vm663_vm1 = vcmask 1043456  }
  0xed   : > { %2841 = vmatprep.subr.bf16.mxu0 %v3605_v0  ;;  %2843 = vmatprep.mubr.msk.bf16.mxu0 %vm3606_vm0, %v3605_v0  ;;  %s4275_s17 = sld [smem:[#allocation21_spill]]  ;;  %v651_v1 = vld [vmem:[%s4220_s2] sm:$0xf]  ;;  %v3075_v6 = vld [vmem:[#allocation8 + $0x4] ss:$8 sps:$4 sm:$0xff]   ;;  %vm659_vm2 = vcmask 64512  }
  0xee   : > { %s641_s4 = scalar_select %p640_p6, %s3717_s27, 1  ;;  %v665_v4 = vsel %vm663_vm1, %v651_v1, 0  ;;  %v3077_v7 = vld [vmem:[#allocation8] ss:$8 sps:$4 sm:$0xff]   ;;  %1064 = vmatprep.subr.bf16.mxu1 %v3075_v6  ;;  %v3078_v8 = vld [vmem:[#allocation8 + $0x14] ss:$8 sps:$4 sm:$0xff]  }
  0xef   : > { %2842 = vmatpush3.bf16.msra.mxu0 %v665_v4  ;;  %1065 = vmatpush1.bf16.msra.mxu1 %v3077_v7  ;;  %v3080_v9 = vld [vmem:[#allocation8 + $0x10] ss:$8 sps:$4 sm:$0xff]   ;;  %v3081_v10 = vld [vmem:[#allocation8 + $0x24] ss:$8 sps:$4 sm:$0xff]   ;;  %v3083_v11 = vld [vmem:[#allocation8 + $0x20] ss:$8 sps:$4 sm:$0xff]  }
  0xf0   : > { %s2797_s10 = sshll.u32 %s641_s4, 4  ;;  %2847 = vmatprep.subr.bf16.mxu0 %v3605_v0  ;;  %1066 = vmatprep.subr.bf16.mxu1 %v3078_v8  ;;  %v3084_v12 = vld [vmem:[#allocation8 + $0x34] ss:$8 sps:$4 sm:$0xff]   ;;  %v3086_v13 = vld [vmem:[#allocation8 + $0x30] ss:$8 sps:$4 sm:$0xff]   ;;  %v3607_v30 = vmov 0  }
  0xf1   : > { %v3087_v14 = vld [vmem:[#allocation8 + $0x44] ss:$8 sps:$4 sm:$0xff]   ;;  %v3089_v15 = vld [vmem:[#allocation8 + $0x40] ss:$8 sps:$4 sm:$0xff]   ;;  %v3090_v16 = vld [vmem:[#allocation8 + $0x54] ss:$8 sps:$4 sm:$0xff]  }
  0xf2   : > { %v3092_v17 = vld [vmem:[#allocation8 + $0x50] ss:$8 sps:$4 sm:$0xff]   ;;  %v3093_v18 = vld [vmem:[#allocation8 + $0x64] ss:$8 sps:$4 sm:$0xff]   ;;  %v3095_v19 = vld [vmem:[#allocation8 + $0x60] ss:$8 sps:$4 sm:$0xff]  }
  0xf3   : > { %s644_s16 = scalar_lea.vmem %s4275_s17, %s2797_s10  ;;  %1067 = vmatpush1.bf16.msra.mxu1 %v3080_v9  ;;  %v3096_v20 = vld [vmem:[#allocation8 + $0x74] ss:$8 sps:$4 sm:$0xff]   ;;  %v3098_v21 = vld [vmem:[#allocation8 + $0x70] ss:$8 sps:$4 sm:$0xff]   ;;  %v3099_v22 = vld [vmem:[#allocation8 + $0x84] ss:$8 sps:$4 sm:$0xff]  }
  0xf4   : > { %v648_v2 = vld [vmem:[%s644_s16] sm:$0xff]  ;;  %v649_v3 = vld [vmem:[%s644_s16 + $0x8] sm:$0xff]  ;;  %1068 = vmatprep.subr.bf16.mxu1 %v3081_v10  ;;  %646 = vst [vmem:[#allocation2] sm:$0xff] %v3607_v30  ;;  %647 = vst [vmem:[#allocation2 + $0x10] sm:$0xff] %v3607_v30  ;;  %vm789_vm3 = vsmask.f32 256 }
  0xf5   : > { %v650_v5 = vpack.c.bf16 %v649_v3, %v648_v2  ;;  %v3101_v23 = vld [vmem:[#allocation8 + $0x80] ss:$8 sps:$4 sm:$0xff]   ;;  %v3102_v24 = vld [vmem:[#allocation8 + $0x94] ss:$8 sps:$4 sm:$0xff]   ;;  %v3104_v25 = vld [vmem:[#allocation8 + $0x90] ss:$8 sps:$4 sm:$0xff]  }
  0xf6   : > { %v3105_v26 = vld [vmem:[#allocation8 + $0xa4] ss:$8 sps:$4 sm:$0xff]   ;;  %v3107_v27 = vld [vmem:[#allocation8 + $0xa0] ss:$8 sps:$4 sm:$0xff]   ;;  %v3108_v28 = vld [vmem:[#allocation8 + $0xb4] ss:$8 sps:$4 sm:$0xff]  }
  0xf7   : > { %2844 = vmatmul.mubr.msk.bf16.vlgmr.msra.gmra.mrb[0].mxu0 %vm659_vm2, %v650_v5  ;;  %1069 = vmatpush1.bf16.msra.mxu1 %v3083_v11  ;;  %v3110_v29 = vld [vmem:[#allocation8 + $0xb0] ss:$8 sps:$4 sm:$0xff]   ;;  %v3111_v31 = vld [vmem:[#allocation8 + $0xc4] ss:$8 sps:$4 sm:$0xff]   ;;  %v3113_v32 = vld [vmem:[#allocation8 + $0xc0] ss:$8 sps:$4 sm:$0xff]  }
  0xf8   : > { %2849 = vmatprep.mubr.msk.bf16.mxu0 %vm3606_vm0, %v3605_v0  ;;  %1070 = vmatprep.subr.bf16.mxu1 %v3084_v12  ;;  %v3114_v33 = vld [vmem:[#allocation8 + $0xd4] ss:$8 sps:$4 sm:$0xff]   ;;  %v3116_v34 = vld [vmem:[#allocation8 + $0xd0] ss:$8 sps:$4 sm:$0xff]   ;;  %v3117_v35 = vld [vmem:[#allocation8 + $0xe4] ss:$8 sps:$4 sm:$0xff]  }
  0xf9   : > { %v3119_v36 = vld [vmem:[#allocation8 + $0xe0] ss:$8 sps:$4 sm:$0xff]   ;;  %v3120_v37 = vld [vmem:[#allocation8 + $0xf4] ss:$8 sps:$4 sm:$0xff]   ;;  %v3122_v38 = vld [vmem:[#allocation8 + $0xf0] ss:$8 sps:$4 sm:$0xff]  }
  0xfa   : > { %v3125_v39 = vld [vmem:[#allocation8 + $0x104] ss:$8 sps:$4 sm:$0xff]   ;;  %v2617_v40 = vld [vmem:[#allocation6] ss:$0 sm:$0xff]  ;;  %v3123_v63 = vld [vmem:[#allocation8 + $0x100] ss:$8 sps:$4 sm:$0xff]  }
  0xfb   : > { %1071 = vmatpush1.bf16.msra.mxu1 %v3086_v13  ;;  %v712_v51 = vld [vmem:[#allocation2] sm:$0x80]  ;;  %v3126_v4 = vld [vmem:[#allocation8 + $0x110] ss:$8 sps:$4 sm:$0xff]   ;;  %v3131_v5 = vld [vmem:[#allocation8 + $0x124] ss:$8 sps:$4 sm:$0xff]  }
  0xfc   : > { %1072 = vmatprep.subr.bf16.mxu1 %v3087_v14  ;;  %v791_v53 = vshrl.u32 %v712_v51, 16  ;;  %v3128_v2 = vld [vmem:[#allocation8 + $0x114] ss:$8 sps:$4 sm:$0xff]   ;;  %v3129_v6 = vld [vmem:[#allocation8 + $0x120] ss:$8 sps:$4 sm:$0xff]   ;;  %vm725_vm4 = vcmask 1046528  }
  0xfd   : > { %v3134_v7 = vld [vmem:[#allocation8 + $0x134] ss:$8 sps:$4 sm:$0xff]   ;;  %v3132_v8 = vld [vmem:[#allocation8 + $0x130] ss:$8 sps:$4 sm:$0xff]   ;;  %v715_v9 = vld [vmem:[#allocation2 + $0x10] sm:$0x1] }
  0xfe   : > { %v793_v59 = vrot.slane %v791_v53, 7  ;;  %v3137_v10 = vld [vmem:[#allocation8 + $0x144] ss:$8 sps:$4 sm:$0xff]   ;;  %v727_v12 = vrot.slane %v715_v9, 1  ;;  %v3135_v13 = vld [vmem:[#allocation8 + $0x140] ss:$8 sps:$4 sm:$0xff]  }
  0xff   : > { %1073 = vmatpush1.bf16.msra.mxu1 %v3089_v15  ;;  %v3140_v14 = vld [vmem:[#allocation8 + $0x154] ss:$8 sps:$4 sm:$0xff]   ;;  %vm1174_vm5 = vcmask 130048   ;;  %v3160_v9 = vld [vmem:[#allocation9 + $0x20] sm:$0xff]   ;;  %s4276_s13 = sld [smem:[#allocation25_spill]]  ;;  %vm1591_vm8 = vcmask 1040384  }
 0x100   : > { %1074 = vmatprep.subr.bf16.mxu1 %v3090_v16  ;;  %v3138_v16 = vld [vmem:[#allocation8 + $0x150] ss:$8 sps:$4 sm:$0xff]   ;;  %vm1463_vm6 = vsmask.f32 7424  ;;  %vm1477_vm7 = vsmask.f32 6400 }
 0x101   : > { %vm1493_vm9 = vcmask 1045504   ;;  %s4277_s11 = sld [smem:[#allocation27_spill]]  ;;  %s4278_s3 = sld [smem:[#allocation28_spill]] }
 0x102   : > { %s2614_s9 = sshll.u32 %s3971_s19, 4  ;;  %s4279_s0 = sld [smem:[#allocation29_spill]] }
 0x103   : > { %1075 = vmatpush1.bf16.msra.mxu1 %v3092_v17  ;;  %v3143_v17 = vld [vmem:[#allocation8 + $0x164] ss:$8 sps:$4 sm:$0xff]   ;;  %s639_s4 = scalar_lea.vmem [#allocation15], %s2614_s9  ;;  %s2798_s28 = sshll.u32 %s3717_s27, 8 }
 0x104   : > { %1076 = vmatprep.subr.bf16.mxu1 %v3093_v18  ;;  %s2452_s10 = sshll.u32 %s639_s4, 4  ;;  %s4280_s16 = sld [smem:[#allocation30_spill]]  ;;  %s4168_s10 = int_to_ptr.vmem [resolvable:$true] %s2452_s10 }
 0x105   : > { %s2439_s25 = scalar_lea.sflag [#allocation5], %s3971_s19  ;;  %s3514_s20 = scalar_lea.vmem %s4168_s10, 256 }
 0x106   : > { %p3515_p9 = scmp.ne.s32.totalorder %s4168_s10, %s3514_s20  ;;  %p4281_p4 = scmp.ne.s32.totalorder %s4265_s18, 0 }
 0x107   : > { %1077 = vmatpush1.bf16.msra.mxu1 %v3095_v19  ;;  %v3141_v19 = vld [vmem:[#allocation8 + $0x160] ss:$8 sps:$4 sm:$0xff]   ;;  %s3608_s27 = smov [#allocation15]  }
 0x108   : > { %1078 = vmatprep.subr.bf16.mxu1 %v3096_v20  ;;  %v3146_v20 = vld [vmem:[#allocation8 + $0x174] ss:$8 sps:$4 sm:$0xff]   ;;  %p3516_p1 = pnand %p3515_p9, %p4281_p4 }
 0x10a   : > { %p3517_p13 = pneg %p3516_p1 }
 0x10b   : > { %1079 = vmatpush1.bf16.msra.mxu1 %v3098_v21 }
 0x10c   : > { %1080 = vmatprep.subr.bf16.mxu1 %v3099_v22  ;;  %v3144_v22 = vld [vmem:[#allocation8 + $0x170] ss:$8 sps:$4 sm:$0xff]  }
 0x10f   : > { %1081 = vmatpush1.bf16.msra.mxu1 %v3101_v23 }
 0x110   : > { %1082 = vmatprep.subr.bf16.mxu1 %v3102_v24 }
 0x113   : > { %1083 = vmatpush1.bf16.msra.mxu1 %v3104_v25 }
 0x114   : > { %1084 = vmatprep.subr.bf16.mxu1 %v3105_v26 }
 0x117   : > { %1085 = vmatpush1.bf16.msra.mxu1 %v3107_v27 }
 0x118   : > { %1086 = vmatprep.subr.bf16.mxu1 %v3108_v28  ;;  %v3148_v28 = vld [vmem:[%s4224_s6] sm:$0xff]  }
 0x11b   : > { %1087 = vmatpush1.bf16.msra.mxu1 %v3110_v29  ;;  %v3149_v29 = vld [vmem:[%s4224_s6 + $0x8] sm:$0xff]  }
 0x11c   : > { %1088 = vmatprep.subr.bf16.mxu1 %v3111_v31  ;;  %v3150_v31 = vld [vmem:[%s4224_s6 + $0x10] sm:$0xff]  }
 0x11f   : > { %1089 = vmatpush1.bf16.msra.mxu1 %v3113_v32  ;;  %v3151_v32 = vld [vmem:[%s4224_s6 + $0x18] sm:$0xff]  }
 0x120   : > { %1090 = vmatprep.subr.bf16.mxu1 %v3114_v33  ;;  %v3152_v33 = vld [vmem:[%s4224_s6 + $0x20] sm:$0xff]  }
 0x123   : > { %1091 = vmatpush1.bf16.msra.mxu1 %v3116_v34  ;;  %v3153_v34 = vld [vmem:[%s4224_s6 + $0x28] sm:$0xff]  }
 0x124   : > { %1092 = vmatprep.subr.bf16.mxu1 %v3117_v35  ;;  %v779_v35 = vlaneseq }
 0x127   : > { %1093 = vmatpush1.bf16.msra.mxu1 %v3119_v36  ;;  %v4046_v36 = vshrl.u32 %v779_v35, 7  ;;  %v3172_v35 = vld [vmem:[#allocation11 + $0x24] ss:$8 sps:$4 sm:$0xff]  }
 0x128   : > { %1094 = vmatprep.subr.bf16.mxu1 %v3120_v37 }
 0x129   : > { %v785_v37 = vsub.s32 1, %v4046_v36 }
 0x12b   : > { %1095 = vmatpush1.bf16.msra.mxu1 %v3122_v38  ;;  %v777_v38 = vld [vmem:[%s4223_s5] sm:$0x3] }
 0x12c   : > { %1107 = vmatprep.subr.bf16.mxu1 %v3125_v39  ;;  %v786_v39 = vrot.slane %v777_v38, %v785_v37 }
 0x1ca   : > { %v701_v41 = vpop.f32.mrb[0].mxu0 }
 0x1cb   : > { %v2845_v42 = vpop.f32.mrb[1].mxu0  ;;  %v4009_v44 = vadd.f32 %v2617_v40, %v701_v41 }
 0x1cc   : > { %v704_v43 = vpop.f32.mrb[2].mxu0 }
 0x1cd   : > { %v4011_v45 = vadd.f32 %v2617_v40, %v704_v43  ;;  %v2846_v46 = vpop.f32.mrb[3].mxu0 }
 0x1cf   : > { %v710_v47 = vpack.c.bf16 %v4011_v45, %v4009_v44 }
 0x1d1   : > { %v717_v48 = vshll.u32 %v710_v47, 16  ;;  %v720_v49 = vshrl.u32 %v710_v47, 16  ;;  %v726_v11 = vrot.slane %v710_v47, 1 }
 0x1d3   : > { %v719_v50 = vrot.slane %v717_v48, 1  ;;  %v794_v54 = vrot.slane %v720_v49, 7  ;;  %v728_v15 = vsel %vm725_vm4, %v726_v11, %v727_v12  ;;  %v810_v23 = vshrl.u32 %v726_v11, 16 }
 0x1d4   : > { %v814_v18 = vshrl.u32 %v728_v15, 16  ;;  %v817_v24 = vshll.u32 %v728_v15, 16 }
 0x1d5   : > { %v722_v52 = vor.u32 %v720_v49, %v719_v50  ;;  %v798_v55 = vshrl.u32 %v719_v50, 16  ;;  %v795_v60 = vor.u32 %v794_v54, %v717_v48  ;;  %v812_v26 = vrot.slane %v810_v23, 7 }
 0x1d6   : > { %v816_v21 = vrot.slane %v814_v18, 7  ;;  %v781_v54 = vsub.s32 0, %v4046_v36  ;;  %v3162_v18 = vld [vmem:[#allocation9 + $0x30] sm:$0xff]   ;;  %v3284_v36 = vld [vmem:[#allocation12] sm:$0xff]  }
 0x1d7   : > { %v802_v56 = vshrl.u32 %v722_v52, 16  ;;  %v805_v58 = vshll.u32 %v722_v52, 16  ;;  %v800_v61 = vrot.slane %v798_v55, 7  ;;  %v796_v3 = vsel %vm789_vm3, %v793_v59, %v795_v60 }
 0x1d8   : > { %v819_v25 = vor.u32 %v817_v24, %v816_v21  ;;  %v782_v55 = vrot.slane %v777_v38, %v781_v54  ;;  %v2671_v21 = vld [vmem:[%s4225_s7] ss:$0 sm:$0xff]  ;;  %v3170_v38 = vld [vmem:[#allocation11 + $0x20] ss:$8 sps:$4 sm:$0xff]  }
 0x1d9   : > { %v804_v57 = vrot.slane %v802_v56, 7 }
 0x1da   : > { %v820_v27 = vsel %vm789_vm3, %v812_v26, %v819_v25 }
 0x1db   : > { %v807_v62 = vor.u32 %v805_v58, %v804_v57 }
 0x1dd   : > { %v808_v1 = vsel %vm789_vm3, %v800_v61, %v807_v62 }
 0x1de   : > { %1096 = vmatprep.mubr.bf16.mxu1 %v808_v1 }
 0x1df   : > { %1097 = vmatmul.mubr.bf16.vlgmr.msra.gmra.mrb[0].mxu1 %v796_v3 }
 0x1e0   : > { %1108 = vmatpush1.bf16.msra.mxu1 %v3123_v63  ;;  %1139 = vmatprep.mubr.bf16.mxu1 %v3607_v30 }
 0x1e1   : > { %1109 = vmatprep.subr.bf16.mxu1 %v3128_v2 }
 0x1e4   : > { %1110 = vmatpush1.bf16.msra.mxu1 %v3126_v4  ;;  %v4066_v4 = vld [vmem:[%s3975_s30] sm:$0xff]  }
 0x1e5   : > { %1111 = vmatprep.subr.bf16.mxu1 %v3131_v5  ;;  %v3156_v5 = vld [vmem:[#allocation9] sm:$0xff]  }
 0x1e8   : > { %1112 = vmatpush1.bf16.msra.mxu1 %v3129_v6  ;;  %v3157_v6 = vld [vmem:[#allocation9 + $0x8] sm:$0xff]  }
 0x1e9   : > { %1113 = vmatprep.subr.bf16.mxu1 %v3134_v7  ;;  %v3158_v7 = vld [vmem:[#allocation9 + $0x10] sm:$0xff]  }
 0x1ec   : > { %1114 = vmatpush1.bf16.msra.mxu1 %v3132_v8  ;;  %v3159_v8 = vld [vmem:[#allocation9 + $0x18] sm:$0xff]  }
 0x1ed   : > { %1115 = vmatprep.subr.bf16.mxu1 %v3137_v10  ;;  %v3161_v10 = vld [vmem:[#allocation9 + $0x28] sm:$0xff]  }
 0x1f0   : > { %1116 = vmatpush1.bf16.msra.mxu1 %v3135_v13 }
 0x1f1   : > { %1117 = vmatprep.subr.bf16.mxu1 %v3140_v14 }
 0x1f4   : > { %1118 = vmatpush1.bf16.msra.mxu1 %v3138_v16 }
 0x1f5   : > { %1119 = vmatprep.subr.bf16.mxu1 %v3143_v17 }
 0x1f8   : > { %1120 = vmatpush1.bf16.msra.mxu1 %v3141_v19  ;;  %v3163_v19 = vld [vmem:[#allocation9 + $0x38] sm:$0xff]  }
 0x1f9   : > { %1121 = vmatprep.subr.bf16.mxu1 %v3146_v20  ;;  %v3166_v20 = vld [vmem:[#allocation11 + $0x4] ss:$8 sps:$4 sm:$0xff]  }
 0x1fc   : > { %1122 = vmatpush1.bf16.msra.mxu1 %v3144_v22 }
 0x1fd   : > { %2853 = vmatprep.subr.bf16.mxu1 %v3605_v0 }
 0x1ff   : > { %1140 = vmatmul.mubr.bf16.vlgmr.msra.gmra.mrb[0].mxu1 %v820_v27 }
 0x200   : > { %2869 = vmatprep.mubr.msk.bf16.mxu1 %vm3606_vm0, %v3605_v0  ;;  %2854 = vmatpush3.bf16.msra.mxu1 %v3148_v28 }
 0x201   : > { %2855 = vmatprep.subr.bf16.mxu1 %v3605_v0 }
 0x204   : > { %2856 = vmatpush3.bf16.msra.mxu1 %v3149_v29 }
 0x205   : > { %2857 = vmatprep.subr.bf16.mxu1 %v3605_v0 }
 0x208   : > { %2858 = vmatpush3.bf16.msra.mxu1 %v3150_v31  ;;  %v3164_v31 = vld [vmem:[#allocation11] ss:$8 sps:$4 sm:$0xff]  }
 0x209   : > { %2859 = vmatprep.subr.bf16.mxu1 %v3605_v0 }
 0x20c   : > { %2860 = vmatpush3.bf16.msra.mxu1 %v3151_v32 }
 0x20d   : > { %2861 = vmatprep.subr.bf16.mxu1 %v3605_v0 }
 0x210   : > { %2862 = vmatpush3.bf16.msra.mxu1 %v3152_v33  ;;  %v3169_v33 = vld [vmem:[#allocation11 + $0x14] ss:$8 sps:$4 sm:$0xff]  }
 0x211   : > { %2863 = vmatprep.subr.bf16.mxu1 %v3605_v0 }
 0x214   : > { %2864 = vmatpush3.bf16.msra.mxu1 %v3153_v34  ;;  %v3167_v34 = vld [vmem:[#allocation11 + $0x10] ss:$8 sps:$4 sm:$0xff]  }
 0x215   : > { %2865 = vmatprep.subr.bf16.mxu1 %v3605_v0 }
 0x2d2   : > { %v1141_v40 = vpop.f32.mrb[0].mxu1 }
 0x2d3   : > { %v1143_v41 = vpop.f32.mrb[1].mxu1  ;;  %v2939_v56 = vadd.f32 %v1141_v40, %v782_v55  ;;  %v3173_v40 = vld [vmem:[#allocation11 + $0x30] ss:$8 sps:$4 sm:$0xff]  }
 0x2d4   : > { %v2940_v42 = vadd.f32 %v1143_v41, %v786_v39  ;;  %v1145_v43 = vpop.f32.mrb[2].mxu1  ;;  %v3178_v41 = vld [vmem:[#allocation11 + $0x44] ss:$8 sps:$4 sm:$0xff]  }
 0x2d5   : > { %v1147_v46 = vpop.f32.mrb[3].mxu1  ;;  %v2941_v58 = vadd.f32 %v1145_v43, %v782_v55  ;;  %v3181_v43 = vld [vmem:[#allocation11 + $0x54] ss:$8 sps:$4 sm:$0xff]   ;;  %v3191_v55 = vld [vmem:[#allocation11 + $0x90] ss:$8 sps:$4 sm:$0xff]  }
 0x2d6   : > { %v2667_v47 = vmul.f32 -1.442695, %v2940_v42  ;;  %v2942_v48 = vadd.f32 %v1147_v46, %v786_v39  ;;  %v3175_v39 = vld [vmem:[#allocation11 + $0x34] ss:$8 sps:$4 sm:$0xff]   ;;  %v3176_v42 = vld [vmem:[#allocation11 + $0x40] ss:$8 sps:$4 sm:$0xff]  }
 0x2d7   : > { %v3179_v46 = vld [vmem:[#allocation11 + $0x50] ss:$8 sps:$4 sm:$0xff]  }
 0x2d8   : > { %3300 = vpow2.f32 %v2667_v47  ;;  %v2668_v49 = vmul.f32 -1.442695, %v2942_v48  ;;  %v3184_v47 = vld [vmem:[#allocation11 + $0x64] ss:$8 sps:$4 sm:$0xff]   ;;  %v3182_v48 = vld [vmem:[#allocation11 + $0x60] ss:$8 sps:$4 sm:$0xff]  }
 0x2da   : > { %3302 = vpow2.f32 %v2668_v49  ;;  %v3187_v49 = vld [vmem:[#allocation11 + $0x74] ss:$8 sps:$4 sm:$0xff]  }
 0x2e2   : > { %v3301_v50 = vpop.eup %3300 }
 0x2e3   : > { %v1156_v51 = vadd.f32 1.0, %v3301_v50  ;;  %v3185_v50 = vld [vmem:[#allocation11 + $0x70] ss:$8 sps:$4 sm:$0xff]  }
 0x2e4   : > { %v3303_v52 = vpop.eup %3302 }
 0x2e5   : > { %3304 = vrcp.f32 %v1156_v51  ;;  %v1157_v53 = vadd.f32 1.0, %v3303_v52  ;;  %v3190_v51 = vld [vmem:[#allocation11 + $0x84] ss:$8 sps:$4 sm:$0xff]   ;;  %v3188_v52 = vld [vmem:[#allocation11 + $0x80] ss:$8 sps:$4 sm:$0xff]  }
 0x2e7   : > { %3306 = vrcp.f32 %v1157_v53  ;;  %v3193_v53 = vld [vmem:[#allocation11 + $0x94] ss:$8 sps:$4 sm:$0xff]  }
 0x2ef   : > { %v3305_v57 = vpop.eup %3304 }
 0x2f0   : > { %v1162_v59 = vmul.f32 %v3305_v57, %v2939_v56  ;;  %v3196_v56 = vld [vmem:[#allocation11 + $0xa4] ss:$8 sps:$4 sm:$0xff]   ;;  %v3194_v57 = vld [vmem:[#allocation11 + $0xa0] ss:$8 sps:$4 sm:$0xff]  }
 0x2f1   : > { %v3307_v60 = vpop.eup %3306 }
 0x2f2   : > { %v1163_v61 = vmul.f32 %v3307_v60, %v2941_v58  ;;  %v1164_v62 = vadd.f32 %v1162_v59, %v4009_v44  ;;  %v3154_v44 = vld [vmem:[%s4224_s6 + $0x30] sm:$0xff]   ;;  %v3199_v58 = vld [vmem:[#allocation11 + $0xb4] ss:$8 sps:$4 sm:$0xff]   ;;  %v3197_v59 = vld [vmem:[#allocation11 + $0xb0] ss:$8 sps:$4 sm:$0xff]  }
 0x2f3   : > { %2866 = vmatpush3.bf16.msra.mxu1 %v3154_v44  ;;  %v3202_v60 = vld [vmem:[#allocation11 + $0xc4] ss:$8 sps:$4 sm:$0xff]  }
 0x2f4   : > { %v1165_v63 = vadd.f32 %v1163_v61, %v4011_v45  ;;  %v4059_v1 = vmul.f32 0.70710677, %v1164_v62  ;;  %2867 = vmatprep.subr.bf16.mxu1 %v3605_v0  ;;  %v3155_v45 = vld [vmem:[%s4224_s6 + $0x38] sm:$0xff]   ;;  %v3200_v61 = vld [vmem:[#allocation11 + $0xc0] ss:$8 sps:$4 sm:$0xff]  }
 0x2f5   : > { %v3205_v62 = vld [vmem:[#allocation11 + $0xd4] ss:$8 sps:$4 sm:$0xff]   ;;  %v3208_v44 = vld [vmem:[#allocation11 + $0xe4] ss:$8 sps:$4 sm:$0xff]  }
 0x2f6   : > { %v4061_v2 = vmul.f32 0.70710677, %v1165_v63  ;;  %v3203_v63 = vld [vmem:[#allocation11 + $0xd0] ss:$8 sps:$4 sm:$0xff]  }
 0x2f7   : > { %2868 = vmatpush3.bf16.msra.mxu1 %v3155_v45  ;;  %v3211_v45 = vld [vmem:[#allocation11 + $0xf4] ss:$8 sps:$4 sm:$0xff]  }
 0x2f8   : > { %v1168_v3 = vpack.c.bf16 %v4061_v2, %v4059_v1  ;;  %2893 = vmatprep.subr.bf16.mxu1 %v3605_v0 }
 0x2fa   : > { %2848 = vmatpush3.bf16.msra.mxu0 %v1168_v3  ;;  %v3206_v3 = vld [vmem:[#allocation11 + $0xe0] ss:$8 sps:$4 sm:$0xff]  }
 0x2fb   : > { %2873 = vmatprep.subr.bf16.mxu0 %v3605_v0 }
 0x2fd   : > { %2850 = vmatmul.mubr.msk.bf16.vlgmr.msra.gmra.mrb[4].mxu0 %vm1174_vm5, %v4066_v4 }
 0x2fe   : > { %2889 = vmatprep.mubr.msk.bf16.mxu0 %vm3606_vm0, %v3605_v0  ;;  %2874 = vmatpush3.bf16.msra.mxu0 %v3156_v5  ;;  %v3209_v5 = vld [vmem:[#allocation11 + $0xf0] ss:$8 sps:$4 sm:$0xff]  }
 0x2ff   : > { %2875 = vmatprep.subr.bf16.mxu0 %v3605_v0 }
 0x302   : > { %2876 = vmatpush3.bf16.msra.mxu0 %v3157_v6  ;;  %v3214_v6 = vld [vmem:[#allocation11 + $0x104] ss:$8 sps:$4 sm:$0xff]  }
 0x303   : > { %2877 = vmatprep.subr.bf16.mxu0 %v3605_v0 }
 0x306   : > { %2878 = vmatpush3.bf16.msra.mxu0 %v3158_v7  ;;  %v2680_v7 = vld [vmem:[%s4276_s13] ss:$0 sm:$0xff] }
 0x307   : > { %2879 = vmatprep.subr.bf16.mxu0 %v3605_v0 }
 0x30a   : > { %2880 = vmatpush3.bf16.msra.mxu0 %v3159_v8 }
 0x30b   : > { %2881 = vmatprep.subr.bf16.mxu0 %v3605_v0 }
 0x30e   : > { %2882 = vmatpush3.bf16.msra.mxu0 %v3160_v9 }
 0x30f   : > { %2883 = vmatprep.subr.bf16.mxu0 %v3605_v0 }
 0x312   : > { %2884 = vmatpush3.bf16.msra.mxu0 %v3161_v10 }
 0x313   : > { %2885 = vmatprep.subr.bf16.mxu0 %v3605_v0 }
 0x316   : > { %2886 = vmatpush3.bf16.msra.mxu0 %v3162_v18  ;;  %v1461_v18 = vld [vmem:[#allocation2 + $0x10] sm:$0x1] }
 0x317   : > { %2887 = vmatprep.subr.bf16.mxu0 %v3605_v0 }
 0x31a   : > { %2888 = vmatpush3.bf16.msra.mxu0 %v3163_v19 }
 0x31b   : > { %2011 = vmatprep.subr.bf16.mxu0 %v3166_v20 }
 0x3d0   : > { %v1212_v11 = vpop.f32.mrb[4].mxu0 }
 0x3d1   : > { %v2851_v12 = vpop.f32.mrb[5].mxu0  ;;  %v1219_v14 = vadd.f32 %v1212_v11, %v4059_v1 }
 0x3d2   : > { %v1215_v13 = vpop.f32.mrb[6].mxu0 }
 0x3d3   : > { %v1220_v15 = vadd.f32 %v1215_v13, %v4061_v2  ;;  %v2852_v16 = vpop.f32.mrb[7].mxu0 }
 0x3d5   : > { %v1221_v17 = vpack.c.bf16 %v1220_v15, %v1219_v14 }
 0x3d7   : > { %2870 = vmatmul.mubr.bf16.vlgmr.msra.gmra.mrb[4].mxu1 %v1221_v17 }
 0x3d8   : > { %2895 = vmatprep.mubr.msk.bf16.mxu1 %vm3606_vm0, %v3605_v0 }
 0x4aa   : > { %v1327_v22 = vpop.f32.mrb[4].mxu1 }
 0x4ab   : > { %v1328_v23 = vadd.f32 %v2671_v21, %v1327_v22  ;;  %v2871_v24 = vpop.f32.mrb[5].mxu1 }
 0x4ac   : > { %v1330_v25 = vpop.f32.mrb[6].mxu1 }
 0x4ad   : > { %v1331_v26 = vadd.f32 %v2671_v21, %v1330_v25  ;;  %v2872_v27 = vpop.f32.mrb[7].mxu1  ;;  %v1334_v28 = vmax.f32 %v1328_v23, 0.0  ;;  %v1457_v21 = vld [vmem:[#allocation2] sm:$0x80]  ;;  %v1487_v23 = vshll.u32 %v1461_v18, 16 }
 0x4ae   : > { %v1465_v24 = vshrl.u32 %v1457_v21, 16 }
 0x4af   : > { %v1335_v29 = vmax.f32 %v1331_v26, 0.0 }
 0x4b1   : > { %v1336_v32 = vpack.c.bf16 %v1335_v29, %v1334_v28  ;;  %v1489_v28 = vrot.slane %v1487_v23, 2  ;;  %v3251_v23 = vld [vmem:[#allocation11 + $0x1d0] ss:$8 sps:$4 sm:$0xff]  }
 0x4b3   : > { %2890 = vmatmul.mubr.bf16.vlgmr.msra.gmra.mrb[8].mxu0 %v1336_v32 }
 0x4b4   : > { %2012 = vmatpush1.bf16.msra.mxu0 %v3164_v31 }
 0x4b5   : > { %2013 = vmatprep.subr.bf16.mxu0 %v3169_v33 }
 0x4b8   : > { %2014 = vmatpush1.bf16.msra.mxu0 %v3167_v34  ;;  %v1592_v34 = vrot.slane %v1457_v21, 7  ;;  %v3253_v21 = vld [vmem:[#allocation11 + $0x1d4] ss:$8 sps:$4 sm:$0xff]  }
 0x4b9   : > { %2015 = vmatprep.subr.bf16.mxu0 %v3172_v35 }
 0x4bc   : > { %2016 = vmatpush1.bf16.msra.mxu0 %v3170_v38 }
 0x4bd   : > { %2017 = vmatprep.subr.bf16.mxu0 %v3175_v39  ;;  %v1495_v39 = vrot.slane %v1461_v18, 2  ;;  %v3248_v18 = vld [vmem:[#allocation11 + $0x1c0] ss:$8 sps:$4 sm:$0xff]  }
 0x4c0   : > { %2018 = vmatpush1.bf16.msra.mxu0 %v3173_v40 }
 0x4c1   : > { %2019 = vmatprep.subr.bf16.mxu0 %v3178_v41 }
 0x4c4   : > { %2020 = vmatpush1.bf16.msra.mxu0 %v3176_v42 }
 0x4c5   : > { %2021 = vmatprep.subr.bf16.mxu0 %v3181_v43 }
 0x4c8   : > { %2022 = vmatpush1.bf16.msra.mxu0 %v3179_v46 }
 0x4c9   : > { %2023 = vmatprep.subr.bf16.mxu0 %v3184_v47  ;;  %v3212_v47 = vld [vmem:[#allocation11 + $0x100] ss:$8 sps:$4 sm:$0xff]  }
 0x4cc   : > { %2024 = vmatpush1.bf16.msra.mxu0 %v3182_v48 }
 0x4cd   : > { %2025 = vmatprep.subr.bf16.mxu0 %v3187_v49 }
 0x4d0   : > { %2026 = vmatpush1.bf16.msra.mxu0 %v3185_v50  ;;  %v3217_v50 = vld [vmem:[#allocation11 + $0x114] ss:$8 sps:$4 sm:$0xff]  }
 0x4d1   : > { %2027 = vmatprep.subr.bf16.mxu0 %v3190_v51 }
 0x4d4   : > { %2028 = vmatpush1.bf16.msra.mxu0 %v3188_v52 }
 0x4d5   : > { %2029 = vmatprep.subr.bf16.mxu0 %v3193_v53 }
 0x4d8   : > { %2030 = vmatpush1.bf16.msra.mxu0 %v3191_v55 }
 0x4d9   : > { %2031 = vmatprep.subr.bf16.mxu0 %v3196_v56 }
 0x4dc   : > { %2032 = vmatpush1.bf16.msra.mxu0 %v3194_v57  ;;  %v3215_v57 = vld [vmem:[#allocation11 + $0x110] ss:$8 sps:$4 sm:$0xff]  }
 0x4dd   : > { %2033 = vmatprep.subr.bf16.mxu0 %v3199_v58  ;;  %v3220_v58 = vld [vmem:[#allocation11 + $0x124] ss:$8 sps:$4 sm:$0xff]  }
 0x4e0   : > { %2034 = vmatpush1.bf16.msra.mxu0 %v3197_v59 }
 0x4e1   : > { %2035 = vmatprep.subr.bf16.mxu0 %v3202_v60  ;;  %v3218_v60 = vld [vmem:[#allocation11 + $0x120] ss:$8 sps:$4 sm:$0xff]  }
 0x4e4   : > { %2036 = vmatpush1.bf16.msra.mxu0 %v3200_v61  ;;  %v3223_v61 = vld [vmem:[#allocation11 + $0x134] ss:$8 sps:$4 sm:$0xff]  }
 0x4e5   : > { %2037 = vmatprep.subr.bf16.mxu0 %v3205_v62  ;;  %v3221_v62 = vld [vmem:[#allocation11 + $0x130] ss:$8 sps:$4 sm:$0xff]  }
 0x4e8   : > { %2038 = vmatpush1.bf16.msra.mxu0 %v3203_v63  ;;  %v3226_v63 = vld [vmem:[#allocation11 + $0x144] ss:$8 sps:$4 sm:$0xff]  }
 0x4e9   : > { %2039 = vmatprep.subr.bf16.mxu0 %v3208_v44  ;;  %v3229_v44 = vld [vmem:[#allocation11 + $0x154] ss:$8 sps:$4 sm:$0xff]  }
 0x4ec   : > { %2040 = vmatpush1.bf16.msra.mxu0 %v3206_v3  ;;  %v3224_v3 = vld [vmem:[#allocation11 + $0x140] ss:$8 sps:$4 sm:$0xff]  }
 0x4ed   : > { %2041 = vmatprep.subr.bf16.mxu0 %v3211_v45  ;;  %v3227_v45 = vld [vmem:[#allocation11 + $0x150] ss:$8 sps:$4 sm:$0xff]  }
 0x4f0   : > { %2042 = vmatpush1.bf16.msra.mxu0 %v3209_v5  ;;  %v3232_v5 = vld [vmem:[#allocation11 + $0x164] ss:$8 sps:$4 sm:$0xff]  }
 0x4f1   : > { %2054 = vmatprep.subr.bf16.mxu0 %v3214_v6  ;;  %v3230_v6 = vld [vmem:[#allocation11 + $0x160] ss:$8 sps:$4 sm:$0xff]  }
 0x586   : > { %v1442_v8 = vpop.f32.mrb[8].mxu0 }
 0x587   : > { %v1443_v9 = vadd.f32 %v2680_v7, %v1442_v8  ;;  %v2891_v10 = vpop.f32.mrb[9].mxu0  ;;  %v3233_v8 = vld [vmem:[#allocation11 + $0x170] ss:$8 sps:$4 sm:$0xff]  }
 0x588   : > { %v1445_v11 = vpop.f32.mrb[10].mxu0  ;;  %v3236_v10 = vld [vmem:[#allocation11 + $0x180] ss:$8 sps:$4 sm:$0xff]  }
 0x589   : > { %v1449_v12 = vmax.f32 %v1443_v9, 0.0  ;;  %v1446_v13 = vadd.f32 %v2680_v7, %v1445_v11  ;;  %v2892_v14 = vpop.f32.mrb[11].mxu0  ;;  %v3235_v7 = vld [vmem:[#allocation11 + $0x174] ss:$8 sps:$4 sm:$0xff]   ;;  %v3238_v9 = vld [vmem:[#allocation11 + $0x184] ss:$8 sps:$4 sm:$0xff]  }
 0x58a   : > { %v3241_v11 = vld [vmem:[#allocation11 + $0x194] ss:$8 sps:$4 sm:$0xff]   ;;  %v3242_v14 = vld [vmem:[#allocation11 + $0x1a0] ss:$8 sps:$4 sm:$0xff]  }
 0x58b   : > { %v1451_v15 = vadd.f32 %v1449_v12, %v4059_v1  ;;  %v1450_v16 = vmax.f32 %v1446_v13, 0.0  ;;  %v3239_v12 = vld [vmem:[#allocation11 + $0x190] ss:$8 sps:$4 sm:$0xff]   ;;  %v3244_v13 = vld [vmem:[#allocation11 + $0x1a4] ss:$8 sps:$4 sm:$0xff]  }
 0x58d   : > { %v1452_v17 = vadd.f32 %v1450_v16, %v4061_v2  ;;  %v4100_v19 = vmul.f32 0.70710677, %v1451_v15  ;;  %v3247_v15 = vld [vmem:[#allocation11 + $0x1b4] ss:$8 sps:$4 sm:$0xff]   ;;  %v3245_v16 = vld [vmem:[#allocation11 + $0x1b0] ss:$8 sps:$4 sm:$0xff]  }
 0x58f   : > { %v4102_v20 = vmul.f32 0.70710677, %v1452_v17  ;;  %v3250_v17 = vld [vmem:[#allocation11 + $0x1c4] ss:$8 sps:$4 sm:$0xff]  }
 0x591   : > { %v4106_v22 = vpack.c.bf16 %v4102_v20, %v4100_v19 }
 0x593   : > { %1456 = vst [vmem:[#allocation2 + $0x8] sm:$0xff] %v4106_v22  ;;  %v1468_v25 = vshll.u32 %v4106_v22, 16  ;;  %v1472_v1 = vshrl.u32 %v4106_v22, 16 }
 0x595   : > { %v1470_v2 = vrot.slane %v1468_v25, 1  ;;  %v1481_v26 = vrot.slane %v1472_v1, 1  ;;  %v1484_v27 = vrot.slane %v1468_v25, 2  ;;  %v3254_v25 = vld [vmem:[#allocation11 + $0x1e0] ss:$8 sps:$4 sm:$0xff]  }
 0x597   : > { %v1471_v29 = vsel %vm1463_vm6, %v1465_v24, %v1470_v2  ;;  %v1474_v31 = vor.u32 %v1472_v1, %v1470_v2  ;;  %v1485_v32 = vor.u32 %v1484_v27, %v1481_v26  ;;  %v3256_v24 = vld [vmem:[#allocation11 + $0x1e4] ss:$8 sps:$4 sm:$0xff]   ;;  %v3259_v1 = vld [vmem:[#allocation11 + $0x1f4] ss:$8 sps:$4 sm:$0xff]   ;;  %v3257_v2 = vld [vmem:[#allocation11 + $0x1f0] ss:$8 sps:$4 sm:$0xff]  }
 0x598   : > { %v1595_v33 = vrot.slane %v1471_v29, 7  ;;  %v3262_v26 = vld [vmem:[#allocation11 + $0x204] ss:$8 sps:$4 sm:$0xff]   ;;  %v3260_v27 = vld [vmem:[#allocation11 + $0x200] ss:$8 sps:$4 sm:$0xff]  }
 0x599   : > { %v1596_v35 = vrot.slane %v1474_v31, 7  ;;  %v1490_v38 = vsel %vm1477_vm7, %v1485_v32, %v1489_v28  ;;  %v1600_v41 = vrot.slane %v1485_v32, 7  ;;  %v3265_v28 = vld [vmem:[#allocation11 + $0x214] ss:$8 sps:$4 sm:$0xff]   ;;  %v3263_v29 = vld [vmem:[#allocation11 + $0x210] ss:$8 sps:$4 sm:$0xff]  }
 0x59a   : > { %v1458_v40 = vld [vmem:[#allocation2 + $0x8] sm:$0x7f]  ;;  %v1601_v42 = vrot.slane %v1490_v38, 7 }
 0x59b   : > { %v1462_v43 = vld [vmem:[#allocation2 + $0x8] sm:$0xfe]  ;;  %v1597_v46 = vsel %vm1591_vm8, %v1595_v33, %v1596_v35  ;;  %v1593_v48 = vrot.slane %v1458_v40, 7 }
 0x59c   : > { %v1494_v49 = vrot.slane %v1462_v43, 2  ;;  %2043 = vmatprep.mubr.bf16.mxu0 %v1597_v46  ;;  %v1602_v55 = vsel %vm1591_vm8, %v1600_v41, %v1601_v42  ;;  %v3268_v31 = vld [vmem:[#allocation11 + $0x224] ss:$8 sps:$4 sm:$0xff]   ;;  %v3266_v32 = vld [vmem:[#allocation11 + $0x220] ss:$8 sps:$4 sm:$0xff]  }
 0x59d   : > { %v1594_v51 = vsel %vm1591_vm8, %v1592_v34, %v1593_v48  ;;  %v3271_v33 = vld [vmem:[#allocation11 + $0x234] ss:$8 sps:$4 sm:$0xff]   ;;  %v3269_v34 = vld [vmem:[#allocation11 + $0x230] ss:$8 sps:$4 sm:$0xff]   ;;  %v3274_v35 = vld [vmem:[#allocation11 + $0x244] ss:$8 sps:$4 sm:$0xff]  }
 0x59e   : > { %v1496_v52 = vsel %vm1493_vm9, %v1494_v49, %v1495_v39  ;;  %v1603_v53 = vrot.slane %v1494_v49, 7  ;;  %2044 = vmatmul.mubr.bf16.vlgmr.msra.gmra.mrb[12].mxu0 %v1594_v51  ;;  %v3272_v38 = vld [vmem:[#allocation11 + $0x240] ss:$8 sps:$4 sm:$0xff]   ;;  %v3277_v39 = vld [vmem:[#allocation11 + $0x254] ss:$8 sps:$4 sm:$0xff]  }
 0x59f   : > { %v1604_v56 = vrot.slane %v1496_v52, 7  ;;  %2055 = vmatpush1.bf16.msra.mxu0 %v3212_v47  ;;  %2086 = vmatprep.mubr.bf16.mxu0 %v1602_v55  ;;  %v3280_v40 = vld [vmem:[#allocation11 + $0x264] ss:$8 sps:$4 sm:$0xff]   ;;  %v3283_v41 = vld [vmem:[#allocation11 + $0x274] ss:$8 sps:$4 sm:$0xff]  }
 0x5a0   : > { %2056 = vmatprep.subr.bf16.mxu0 %v3217_v50  ;;  %v3281_v42 = vld [vmem:[#allocation11 + $0x270] ss:$8 sps:$4 sm:$0xff]   ;;  %v1577_v43 = vld [vmem:[%s4277_s11] sm:$0x3]  ;;  %s4174_s11 = scalar_lea.hbm %s4280_s16, %s2798_s28 }
 0x5a1   : > { %v4115_v59 = vsel %vm1591_vm8, %v1603_v53, %v1604_v56  ;;  %v1586_v46 = vrot.slane %v1577_v43, %v785_v37 }
 0x5a3   : > { %2057 = vmatpush1.bf16.msra.mxu0 %v3215_v57 }
 0x5a4   : > { %2058 = vmatprep.subr.bf16.mxu0 %v3220_v58 }
 0x5a7   : > { %2059 = vmatpush1.bf16.msra.mxu0 %v3218_v60  ;;  %v1582_v60 = vrot.slane %v1577_v43, %v781_v54  ;;  %v3285_v54 = vld [vmem:[#allocation12 + $0x8] sm:$0xff]  }
 0x5a8   : > { %2060 = vmatprep.subr.bf16.mxu0 %v3223_v61 }
 0x5ab   : > { %2061 = vmatpush1.bf16.msra.mxu0 %v3221_v62 }
 0x5ac   : > { %2062 = vmatprep.subr.bf16.mxu0 %v3226_v63 }
 0x5af   : > { %2063 = vmatpush1.bf16.msra.mxu0 %v3224_v3 }
 0x5b0   : > { %2064 = vmatprep.subr.bf16.mxu0 %v3229_v44 }
 0x5b3   : > { %2065 = vmatpush1.bf16.msra.mxu0 %v3227_v45 }
 0x5b4   : > { %2066 = vmatprep.subr.bf16.mxu0 %v3232_v5 }
 0x5b7   : > { %2067 = vmatpush1.bf16.msra.mxu0 %v3230_v6 }
 0x5b8   : > { %2068 = vmatprep.subr.bf16.mxu0 %v3235_v7 }
 0x5bb   : > { %2069 = vmatpush1.bf16.msra.mxu0 %v3233_v8 }
 0x5bc   : > { %2070 = vmatprep.subr.bf16.mxu0 %v3238_v9  ;;  %v3288_v9 = vld [vmem:[#allocation12 + $0x20] sm:$0xff]  }
 0x5bf   : > { %2071 = vmatpush1.bf16.msra.mxu0 %v3236_v10  ;;  %v3290_v10 = vld [vmem:[#allocation12 + $0x30] sm:$0xff]  }
 0x5c0   : > { %2072 = vmatprep.subr.bf16.mxu0 %v3241_v11  ;;  %v3291_v11 = vld [vmem:[#allocation12 + $0x38] sm:$0xff]  }
 0x5c3   : > { %2073 = vmatpush1.bf16.msra.mxu0 %v3239_v12 }
 0x5c4   : > { %2074 = vmatprep.subr.bf16.mxu0 %v3244_v13 }
 0x5c7   : > { %2075 = vmatpush1.bf16.msra.mxu0 %v3242_v14 }
 0x5c8   : > { %2076 = vmatprep.subr.bf16.mxu0 %v3247_v15 }
 0x5cb   : > { %2077 = vmatpush1.bf16.msra.mxu0 %v3245_v16 }
 0x5cc   : > { %2078 = vmatprep.subr.bf16.mxu0 %v3250_v17 }
 0x5cf   : > { %2079 = vmatpush1.bf16.msra.mxu0 %v3248_v18  ;;  %v3292_v18 = vld [vmem:[#allocation14] sm:$0xff]  }
 0x5d0   : > { %2080 = vmatprep.subr.bf16.mxu0 %v3253_v21 }
 0x5d3   : > { %2081 = vmatpush1.bf16.msra.mxu0 %v3251_v23  ;;  %v3293_v23 = vld [vmem:[#allocation14 + $0x8] sm:$0xff]  }
 0x5d4   : > { %2082 = vmatprep.subr.bf16.mxu0 %v3256_v24  ;;  %v3294_v24 = vld [vmem:[#allocation14 + $0x10] sm:$0xff]  }
 0x5d7   : > { %2083 = vmatpush1.bf16.msra.mxu0 %v3254_v25  ;;  %v3295_v25 = vld [vmem:[#allocation14 + $0x18] sm:$0xff]  }
 0x5d8   : > { %2084 = vmatprep.subr.bf16.mxu0 %v3259_v1  ;;  %v3296_v1 = vld [vmem:[#allocation14 + $0x20] sm:$0xff]  }
 0x5db   : > { %2085 = vmatpush1.bf16.msra.mxu0 %v3257_v2  ;;  %v3297_v2 = vld [vmem:[#allocation14 + $0x28] sm:$0xff]  }
 0x5dc   : > { %2097 = vmatprep.subr.bf16.mxu0 %v3262_v26  ;;  %v3298_v26 = vld [vmem:[#allocation14 + $0x30] sm:$0xff]  }
 0x5de   : > { %2087 = vmatmul.mubr.bf16.vlgmr.msra.gmra.mrb[12].mxu0 %v4106_v22  ;;  %v3275_v22 = vld [vmem:[#allocation11 + $0x250] ss:$8 sps:$4 sm:$0xff]  }
 0x5df   : > { %2098 = vmatpush1.bf16.msra.mxu0 %v3260_v27  ;;  %2129 = vmatprep.mubr.bf16.mxu0 %v3607_v30  ;;  %v3278_v30 = vld [vmem:[#allocation11 + $0x260] ss:$8 sps:$4 sm:$0xff]   ;;  %v3299_v27 = vld [vmem:[#allocation14 + $0x38] sm:$0xff]  }
 0x5e0   : > { %2099 = vmatprep.subr.bf16.mxu0 %v3265_v28  ;;  %v2773_v28 = vld [vmem:[%s4278_s3] ss:$0 sm:$0xff]  ;;  %s3518_s3 = sshll.u32 %s3608_s27, 4  ;;  %s3519_s3 = int_to_ptr.vmem [resolvable:$false] %s3518_s3 }
 0x5e1   : > { %s3520_s9 = scalar_lea.vmem %s3519_s3, 512  ;;  %p3521_p0 = scmp.lt.s32.totalorder %s4168_s10, %s3519_s3 }
 0x5e2   : > { %p3522_p2 = scmp.lt.s32.totalorder %s3520_s9, %s3514_s20 }
 0x5e3   : > { %2100 = vmatpush1.bf16.msra.mxu0 %v3263_v29 }
 0x5e4   : > { %2101 = vmatprep.subr.bf16.mxu0 %v3268_v31  ;;  %p3523_p8 = por %p3522_p2, %p3521_p0 }
 0x5e6   : > { %p3524_p10 = pnand %p3523_p8, %p3517_p13 }
 0x5e7   : > { %2102 = vmatpush1.bf16.msra.mxu0 %v3266_v32 }
 0x5e8   : > { %2103 = vmatprep.subr.bf16.mxu0 %v3271_v33 }
 0x5eb   : > { %2104 = vmatpush1.bf16.msra.mxu0 %v3269_v34 }
 0x5ec   : > { %2105 = vmatprep.subr.bf16.mxu0 %v3274_v35 }
 0x5ef   : > { %2106 = vmatpush1.bf16.msra.mxu0 %v3272_v38 }
 0x5f0   : > { %2107 = vmatprep.subr.bf16.mxu0 %v3277_v39 }
 0x5f3   : > { %2108 = vmatpush1.bf16.msra.mxu0 %v3275_v22 }
 0x5f4   : > { %2109 = vmatprep.subr.bf16.mxu0 %v3280_v40 }
 0x5f7   : > { %2110 = vmatpush1.bf16.msra.mxu0 %v3278_v30 }
 0x5f8   : > { %2111 = vmatprep.subr.bf16.mxu0 %v3283_v41 }
 0x5fb   : > { %2112 = vmatpush1.bf16.msra.mxu0 %v3281_v42 }
 0x5fe   : > { %2130 = vmatmul.mubr.bf16.vlgmr.msra.gmra.mrb[12].mxu0 %v4115_v59 }
 0x6d1   : > { %v2131_v47 = vpop.f32.mrb[12].mxu0 }
 0x6d2   : > { %v2133_v48 = vpop.f32.mrb[13].mxu0  ;;  %v2943_v37 = vadd.f32 %v2131_v47, %v1582_v60 }
 0x6d3   : > { %v2944_v49 = vadd.f32 %v2133_v48, %v1586_v46  ;;  %v2135_v50 = vpop.f32.mrb[14].mxu0 }
 0x6d4   : > { %v2137_v51 = vpop.f32.mrb[15].mxu0  ;;  %v2945_v62 = vadd.f32 %v2135_v50, %v1582_v60 }
 0x6d5   : > { %v2770_v52 = vmul.f32 -1.442695, %v2944_v49  ;;  %v2946_v53 = vadd.f32 %v2137_v51, %v1586_v46 }
 0x6d7   : > { %3308 = vpow2.f32 %v2770_v52  ;;  %v2771_v55 = vmul.f32 -1.442695, %v2946_v53 }
 0x6d9   : > { %3310 = vpow2.f32 %v2771_v55 }
 0x6e1   : > { %v3309_v56 = vpop.eup %3308 }
 0x6e2   : > { %v2146_v57 = vadd.f32 1.0, %v3309_v56 }
 0x6e3   : > { %v3311_v58 = vpop.eup %3310 }
 0x6e4   : > { %3312 = vrcp.f32 %v2146_v57  ;;  %v2147_v59 = vadd.f32 1.0, %v3311_v58 }
 0x6e6   : > { %3314 = vrcp.f32 %v2147_v59 }
 0x6ee   : > { %v3313_v61 = vpop.eup %3312 }
 0x6ef   : > { %v2152_v63 = vmul.f32 %v3313_v61, %v2943_v37 }
 0x6f0   : > { %v3315_v3 = vpop.eup %3314 }
 0x6f1   : > { %v2153_v44 = vmul.f32 %v3315_v3, %v2945_v62  ;;  %v2154_v45 = vadd.f32 %v2152_v63, %v4100_v19  ;;  %v3286_v19 = vld [vmem:[#allocation12 + $0x10] sm:$0xff]  }
 0x6f3   : > { %v2155_v5 = vadd.f32 %v2153_v44, %v4102_v20  ;;  %v4129_v6 = vmul.f32 0.70710677, %v2154_v45  ;;  %v3287_v20 = vld [vmem:[#allocation12 + $0x18] sm:$0xff]  }
 0x6f5   : > { %v4131_v7 = vmul.f32 0.70710677, %v2155_v5 }
 0x6f7   : > { %v2158_v8 = vpack.c.bf16 %v4131_v7, %v4129_v6 }
 0x6f9   : > { %2894 = vmatpush3.bf16.msra.mxu1 %v2158_v8 }
 0x6fa   : > { %2899 = vmatprep.subr.bf16.mxu1 %v3605_v0 }
 0x6fc   : > { %2896 = vmatmul.mubr.msk.bf16.vlgmr.msra.gmra.mrb[8].mxu1 %vm1174_vm5, %v4066_v4  ;;  %v3289_v4 = vld [vmem:[#allocation12 + $0x28] sm:$0xff]  }
 0x6fd   : > { %2900 = vmatpush3.bf16.msra.mxu1 %v3284_v36  ;;  %2915 = vmatprep.mubr.msk.bf16.mxu1 %vm3606_vm0, %v3605_v0 }
 0x6fe   : > { %2901 = vmatprep.subr.bf16.mxu1 %v3605_v0 }
 0x701   : > { %2902 = vmatpush3.bf16.msra.mxu1 %v3285_v54 }
 0x702   : > { %2903 = vmatprep.subr.bf16.mxu1 %v3605_v0 }
 0x705   : > { %2904 = vmatpush3.bf16.msra.mxu1 %v3286_v19 }
 0x706   : > { %2905 = vmatprep.subr.bf16.mxu1 %v3605_v0 }
 0x709   : > { %2906 = vmatpush3.bf16.msra.mxu1 %v3287_v20 }
 0x70a   : > { %2907 = vmatprep.subr.bf16.mxu1 %v3605_v0 }
 0x70d   : > { %2908 = vmatpush3.bf16.msra.mxu1 %v3288_v9 }
 0x70e   : > { %2909 = vmatprep.subr.bf16.mxu1 %v3605_v0 }
 0x711   : > { %2910 = vmatpush3.bf16.msra.mxu1 %v3289_v4 }
 0x712   : > { %2911 = vmatprep.subr.bf16.mxu1 %v3605_v0 }
 0x715   : > { %2912 = vmatpush3.bf16.msra.mxu1 %v3290_v10 }
 0x716   : > { %2913 = vmatprep.subr.bf16.mxu1 %v3605_v0 }
 0x719   : > { %2914 = vmatpush3.bf16.msra.mxu1 %v3291_v11 }
 0x71a   : > { %2919 = vmatprep.subr.bf16.mxu1 %v3605_v0 }
 0x7cf   : > { %v2193_v12 = vpop.f32.mrb[8].mxu1 }
 0x7d0   : > { %v2897_v13 = vpop.f32.mrb[9].mxu1  ;;  %v2200_v15 = vadd.f32 %v2193_v12, %v4129_v6 }
 0x7d1   : > { %v2196_v14 = vpop.f32.mrb[10].mxu1 }
 0x7d2   : > { %v2201_v16 = vadd.f32 %v2196_v14, %v4131_v7  ;;  %v2898_v17 = vpop.f32.mrb[11].mxu1 }
 0x7d4   : > { %v2202_v21 = vpack.c.bf16 %v2201_v16, %v2200_v15 }
 0x7d6   : > { %2916 = vmatmul.mubr.bf16.vlgmr.msra.gmra.mrb[12].mxu1 %v2202_v21 }
 0x7d7   : > { %2920 = vmatpush3.bf16.msra.mxu1 %v3292_v18  ;;  %2935 = vmatprep.mubr.msk.bf16.mxu1 %vm3606_vm0, %v3605_v0 }
 0x7d8   : > { %2921 = vmatprep.subr.bf16.mxu1 %v3605_v0 }
 0x7db   : > { %2922 = vmatpush3.bf16.msra.mxu1 %v3293_v23 }
 0x7dc   : > { %2923 = vmatprep.subr.bf16.mxu1 %v3605_v0 }
 0x7df   : > { %2924 = vmatpush3.bf16.msra.mxu1 %v3294_v24 }
 0x7e0   : > { %2925 = vmatprep.subr.bf16.mxu1 %v3605_v0 }
 0x7e3   : > { %2926 = vmatpush3.bf16.msra.mxu1 %v3295_v25 }
 0x7e4   : > { %2927 = vmatprep.subr.bf16.mxu1 %v3605_v0 }
 0x7e7   : > { %2928 = vmatpush3.bf16.msra.mxu1 %v3296_v1 }
 0x7e8   : > { %2929 = vmatprep.subr.bf16.mxu1 %v3605_v0 }
 0x7eb   : > { %2930 = vmatpush3.bf16.msra.mxu1 %v3297_v2 }
 0x7ec   : > { %2931 = vmatprep.subr.bf16.mxu1 %v3605_v0 }
 0x7ef   : > { %2932 = vmatpush3.bf16.msra.mxu1 %v3298_v26 }
 0x7f0   : > { %2933 = vmatprep.subr.bf16.mxu1 %v3605_v0  ;;  %v2782_v0 = vld [vmem:[%s4279_s0] ss:$0 sm:$0xff] }
 0x7f3   : > { %2934 = vmatpush3.bf16.msra.mxu1 %v3299_v27 }
 0x8a9   : > { %v2308_v29 = vpop.f32.mrb[12].mxu1 }
 0x8aa   : > { %v2309_v31 = vadd.f32 %v2773_v28, %v2308_v29  ;;  %v2917_v32 = vpop.f32.mrb[13].mxu1 }
 0x8ab   : > { %v2311_v33 = vpop.f32.mrb[14].mxu1 }
 0x8ac   : > { %v2312_v34 = vadd.f32 %v2773_v28, %v2311_v33  ;;  %v2918_v35 = vpop.f32.mrb[15].mxu1  ;;  %v2315_v38 = vmax.f32 %v2309_v31, 0.0 }
 0x8ae   : > { %v2316_v39 = vmax.f32 %v2312_v34, 0.0 }
 0x8b0   : > { %v2317_v22 = vpack.c.bf16 %v2316_v39, %v2315_v38 }
 0x8b2   : > { %2936 = vmatmul.mubr.bf16.vlgmr.msra.gmra.mrb[16].mxu1 %v2317_v22 }
 0x985   : > { %v2423_v40 = vpop.f32.mrb[16].mxu1 }
 0x986   : > { %v2424_v30 = vadd.f32 %v2782_v0, %v2423_v40  ;;  %v2937_v41 = vpop.f32.mrb[17].mxu1 }
 0x987   : > { %v2426_v42 = vpop.f32.mrb[18].mxu1 }
 0x988   : > { %v2430_v43 = vmax.f32 %v2424_v30, 0.0  ;;  %v2427_v46 = vadd.f32 %v2782_v0, %v2426_v42  ;;  %v2938_v47 = vpop.f32.mrb[19].mxu1 }
 0x98a   : > { %v2432_v48 = vadd.f32 %v2430_v43, %v4129_v6  ;;  %v2431_v49 = vmax.f32 %v2427_v46, 0.0 }
 0x98c   : > { %v2434_v50 = vmul.f32 0.70710677, %v2432_v48  ;;  %v2433_v51 = vadd.f32 %v2431_v49, %v4131_v7 }
 0x98e   : > { %2436 = vst [vmem:[%s639_s4] sm:$0xff] %v2434_v50  ;;  %v2435_v52 = vmul.f32 0.70710677, %v2433_v51 }
 0x990   : > { %2437 = vst [vmem:[%s639_s4 + $0x8] sm:$0xff] %v2435_v52 }
 0x991   : > { %3527 = shalt.err (!%p3524_p10)
}
 0x992   : > { %s3528_s26 = scalar_lea.hbm %s4174_s11, 256  ;;  %s3532_s4 = scalar_lea.hbm %s4280_s16, 512 }
 0x993   : > { %p3529_p11 = scmp.ne.s32.totalorder %s4174_s11, %s3528_s26  ;;  %p3533_p5 = scmp.lt.u32.totalorder %s4174_s11, %s4280_s16 }
 0x994   : > { %p3534_p7 = scmp.lt.u32.totalorder %s3532_s4, %s3528_s26  ;;  %p3536_p9 = scmp.lt.u32.totalorder %s3528_s26, %s4174_s11 }
 0x995   : > { %p3530_p12 = pnand %p3529_p11, %p4281_p4 }
 0x996   : > { %p3535_p6 = por %p3534_p7, %p3533_p5 }
 0x997   : > { %p3531_p3 = pneg %p3530_p12 }
 0x998   : > { %p3537_p1 = por %p3536_p9, %p3535_p6 }
 0x99a   : > { %p3538_p13 = pnand %p3537_p1, %p3531_p3 }
 0x99c   : > { %3541 = shalt.err (!%p3538_p13)
}
 0x99d   : > { %s3609_s17 = smov 128   ;;  %s3610_s20 = smov 8  }
 0x99e   : > { %2985 = dma.vmem_to_hbm [thread:$0]  (%p4281_p4), %s4168_s10, 256, %s4174_s11, %s2439_s25, %s3609_s17, %s3609_s17, %s3610_s20  }
 0x99f PF: > { %s2467_s27 = sand.u32 1, %s3580_s21   ;;  %p4282_p0 = scmp.ne.s32.totalorder %s4266_s8, 0 }
 0x9a0   : > { %p4283_p2 = scmp.ge.s32.totalorder %s3592_s24, 2  ;;  %s2468_s3 = scalar_lea.sflag [#allocation5], %s2467_s27 }
 0x9a2   : > { %p3011_p8 = pnand %p4283_p2, %p4282_p0 }
 0x9a4   : > { %3575 = dma.done.wait (!%p3011_p8), %s2468_s3, 256  }
 0x9a5   : > { %3577 = vsyncadd (!%p3011_p8), %s2468_s3, 4294967040  ;;  %p32_p10 = scmp.ge.s32.totalorder %s3889_s29, 4   ;;  %s4284_s21 = smov %s3584_s22 }
 0x9a6   : > { %s4285_s22 = smov %s3588_s23  ;;  %s4286_s23 = smov %s3900_s15 }
 0x9a7   : > { %s4287_s24 = smov %s3889_s29  ;;  %34 = sbr.rel (!%p32_p10) target bundleno = 19 (0x13), region = 156 }
 0x9ae   :  { %2473 = vsyncpa [#allocation4], 1 }
 0x9af   :  { %2475 = vsyncpa [#allocation4 + $0x1], 1 }
 0x9b0   :  { %2476 = vsyncpa [#allocation7], 1 }
 0x9b1   :  { %2477 = vsyncpa [#allocation10], 1 }
 0x9b2   :  { %2478 = vsyncpa [#allocation13], 1 }
 0x9b3   :  { %2479 = vsyncpa [#allocation5], 1 }
 0x9b4   :  { %2481 = vsyncpa [#allocation5 + $0x1], 1 }

</bundles_post_ra>
